<compile_context>
chip_gen: v7x
topology: tpu7x:2x2x1
jax: 0.10.0
libtpu: 0.0.40
codegen_flags: <defaults>
</compile_context>

<pallas_src>
import functools

import jax
import jax.numpy as jnp
from jax.experimental import pallas as pl
from jax.experimental.pallas import tpu as pltpu

# ----------------------------- model dims ------------------------------------
INPUT_DIM = 6      # ['Avg CO','Avg SO2','Avg PM2.5','Avg PM10','Avg NO2','Avg OZONE']
HIDDEN_DIM = 32
OUTPUT_DIM = 1
DROPOUT_RATE = 0.2

FIN_P = 8          # x feature columns padded 6 -> 8
OUT_P = 8          # output columns padded 1 -> 8 (narrow writeback, sliced after)
NODE_PAD = 256     # node count padded host-side to a multiple of 256

# Padded-N ceiling for the fully VMEM-resident single-kernel path.
# A_hat (bf16, double-buffered) + temporaries stay well under VMEM on v5e/v6e (128 MiB)
# and v7x (64 MiB).
RESIDENT_MAX_NODES = 1024


# ----------------------------- tiling helpers ---------------------------------
def _round_up(n, m):
    return ((n + m - 1) // m) * m


def _row_tile(n):
    # n is always a multiple of 256 after host-side padding.
    del n
    return 256


def _k_tile(n):
    # Large contraction tiles: per-step MXU work is tiny (output width 32), so fewer
    # grid steps -> less fixed per-step overhead.  256x2048 bf16 tile = 1 MiB/buffer.
    for t in (2048, 1024, 512, 256):
        if n % t == 0:
            return t
    return n


# ------------------------------- kernels --------------------------------------
def gcn_layer_kernel(*refs, apply_relu, apply_mask):
    """One fused GCNConv layer tile.

    acc[i] += A_hat[i, k] @ (H_in[k, :] @ W); on the last k step add bias, apply ReLU
    and the inverted-dropout mask, and cast to the output dtype.
    """
    if apply_mask:
        a_ref, h_ref, w_ref, b_ref, mask_ref, o_ref, acc_ref = refs
    else:
        a_ref, h_ref, w_ref, b_ref, o_ref, acc_ref = refs

    k = pl.program_id(1)

    @pl.when(k == 0)
    def _():
        acc_ref[...] = jnp.zeros(acc_ref.shape, acc_ref.dtype)

    # Fused feature transform (tiny: fin <= 32) -- free filler under the A_hat DMA.
    z = jnp.dot(h_ref[...].astype(jnp.float32), w_ref[...],
                preferred_element_type=jnp.float32)
    acc_ref[...] += jnp.dot(a_ref[...], z.astype(jnp.bfloat16),
                            preferred_element_type=jnp.float32)

    @pl.when(k == pl.num_programs(1) - 1)
    def _():
        h = acc_ref[...] + b_ref[...]
        if apply_relu:
            h = jnp.maximum(h, 0.0)
        if apply_mask:
            h = h * mask_ref[...].astype(jnp.float32)
        o_ref[...] = h.astype(o_ref.dtype)


def gcn_resident_kernel(*refs, apply_mask):
    """Whole 3-layer GCN forward with A_hat resident in VMEM (small/medium graphs)."""
    if apply_mask:
        (a_ref, x_ref, w1_ref, b1_ref, w2_ref, b2_ref, w3_ref, b3_ref,
         m1_ref, m2_ref, o_ref) = refs
        m1, m2 = m1_ref, m2_ref
    else:
        (a_ref, x_ref, w1_ref, b1_ref, w2_ref, b2_ref, w3_ref, b3_ref,
         o_ref) = refs
        m1 = m2 = None

    def layer(h, w_ref, b_ref, m_ref, relu):
        z = jnp.dot(h.astype(jnp.float32), w_ref[...],
                    preferred_element_type=jnp.float32)
        out = jnp.dot(a_ref[...], z.astype(jnp.bfloat16),
                      preferred_element_type=jnp.float32) + b_ref[...]
        if relu:
            out = jnp.maximum(out, 0.0)
        if m_ref is not None:
            out = out * m_ref[...].astype(jnp.float32)
        return out

    h1 = layer(x_ref[...], w1_ref, b1_ref, m1, True)
    h2 = layer(h1, w2_ref, b2_ref, m2, True)
    h3 = layer(h2, w3_ref, b3_ref, None, False)
    o_ref[...] = h3.astype(o_ref.dtype)


# ------------------------------ pallas wrappers --------------------------------
def _gcn_layer_tiled(a_hat, h_in, w, b, mask, *, apply_relu, out_dtype):
    """Row x k tiled fused GCNConv layer: A_hat @ (H_in @ W) + b (+ReLU, *mask)."""
    n = a_hat.shape[0]
    fin = h_in.shape[1]
    fout = w.shape[1]
    tm = _row_tile(n)
    tk = _k_tile(n)

    in_specs = [
        pl.BlockSpec((tm, tk), lambda i, k: (i, k)),     # A_hat tile (bf16)
        pl.BlockSpec((tk, fin), lambda i, k: (k, 0)),    # input-feature contraction strip
        pl.BlockSpec((fin, fout), lambda i, k: (0, 0)),  # weights (resident)
        pl.BlockSpec((1, fout), lambda i, k: (0, 0)),    # bias (resident)
    ]
    operands = [a_hat, h_in, w, b]
    if mask is not None:
        in_specs.append(pl.BlockSpec((tm, fout), lambda i, k: (i, 0)))
        operands.append(mask)

    kernel = functools.partial(gcn_layer_kernel, apply_relu=apply_relu,
                               apply_mask=mask is not None)
    bytes_accessed = (
        a_hat.size * a_hat.dtype.itemsize
        + (n // tm) * h_in.size * h_in.dtype.itemsize      # strip re-read per row tile
        + w.size * w.dtype.itemsize
        + b.size * b.dtype.itemsize
        + n * fout * jnp.dtype(out_dtype).itemsize
        + (mask.size * mask.dtype.itemsize if mask is not None else 0)
    )
    return pl.pallas_call(
        kernel,
        out_shape=jax.ShapeDtypeStruct((n, fout), out_dtype),
        grid=(n // tm, n // tk),
        in_specs=in_specs,
        out_specs=pl.BlockSpec((tm, fout), lambda i, k: (i, 0)),
        scratch_shapes=[pltpu.VMEM((tm, fout), jnp.float32)],
        compiler_params=pltpu.CompilerParams(
            # rows are independent (megacore-shardable); k carries the accumulator
            dimension_semantics=("parallel", "arbitrary"),
            vmem_limit_bytes=32 << 20,
        ),
        cost_estimate=pl.CostEstimate(
            flops=2 * n * n * fout + 2 * n * fin * fout,
            transcendentals=0,
            bytes_accessed=int(bytes_accessed),
        ),
    )(*operands)


def _gcn_forward_resident(a_hat, x_p, w1, b1, w2, b2, w3, b3, masks):
    """Single fused kernel for the whole forward pass (A_hat resident in VMEM)."""
    n = a_hat.shape[0]
    apply_mask = masks is not None
    operands = [a_hat, x_p, w1, b1, w2, b2, w3, b3]
    if apply_mask:
        operands += list(masks)

    def full_spec(arr):
        return pl.BlockSpec(arr.shape, lambda i: (0,) * arr.ndim)

    in_specs = [full_spec(op) for op in operands]
    kernel = functools.partial(gcn_resident_kernel, apply_mask=apply_mask)

    flops = (2 * n * n * (2 * HIDDEN_DIM + OUT_P)
             + 2 * n * (FIN_P * HIDDEN_DIM + HIDDEN_DIM * HIDDEN_DIM + HIDDEN_DIM * OUT_P))
    bytes_accessed = sum(op.size * op.dtype.itemsize for op in operands) + n * OUT_P * 4

    return pl.pallas_call(
        kernel,
        out_shape=jax.ShapeDtypeStruct((n, OUT_P), jnp.float32),
        grid=(1,),
        in_specs=in_specs,
        out_specs=pl.BlockSpec((n, OUT_P), lambda i: (0, 0)),
        compiler_params=pltpu.CompilerParams(
            dimension_semantics=("arbitrary",),
            vmem_limit_bytes=48 << 20,   # above v5e's 16 MiB default, below v7x's 64 MiB
        ),
        cost_estimate=pl.CostEstimate(
            flops=int(flops), transcendentals=0, bytes_accessed=int(bytes_accessed)),
    )(*operands)


# ----------------------------- plain-JAX glue ----------------------------------
def build_normalized_adjacency(edge_index, num_nodes):
    """Dense GCN normalization: D^{-1/2} (A + I) D^{-1/2}, stored as bf16 for the MXU."""
    a = jnp.zeros((num_nodes, num_nodes), jnp.float32)
    if edge_index.shape[1] > 0:
        src, dst = edge_index[0], edge_index[1]
        a = a.at[dst, src].set(1.0)
    a = a + jnp.eye(num_nodes, dtype=jnp.float32)      # add self-loops
    deg = jnp.sum(a, axis=1)
    d_inv_sqrt = 1.0 / jnp.sqrt(deg)
    a_hat = a * d_inv_sqrt[:, None] * d_inv_sqrt[None, :]
    return a_hat.astype(jnp.bfloat16)                  # f32 accumulation happens on-MXU


def _pad2(x, rows, cols):
    out = jnp.zeros((rows, cols), x.dtype)
    return out.at[: x.shape[0], : x.shape[1]].set(x)


def make_dropout_masks(key, num_nodes, rate=DROPOUT_RATE):
    """Inverted-dropout masks (training mode), bf16 (0 and 1/keep=1.25 are exact)."""
    keep = 1.0 - rate
    k1, k2 = jax.random.split(key)
    m1 = (jax.random.bernoulli(k1, keep, (num_nodes, HIDDEN_DIM)) / keep).astype(jnp.bfloat16)
    m2 = (jax.random.bernoulli(k2, keep, (num_nodes, HIDDEN_DIM)) / keep).astype(jnp.bfloat16)
    return m1, m2


def init_params(key):
    """Deterministic glorot-ish init; GCNConv = linear weight (Fin, Fout) + bias."""
    ks = jax.random.split(key, 3)

    def glorot(k, fin, fout):
        lim = jnp.sqrt(6.0 / (fin + fout))
        return jax.random.uniform(k, (fin, fout), jnp.float32, -lim, lim)

    w1 = glorot(ks[0], INPUT_DIM, HIDDEN_DIM)
    w2 = glorot(ks[1], HIDDEN_DIM, HIDDEN_DIM)
    w3 = glorot(ks[2], HIDDEN_DIM, OUTPUT_DIM)
    b1 = jnp.zeros((HIDDEN_DIM,), jnp.float32)
    b2 = jnp.zeros((HIDDEN_DIM,), jnp.float32)
    b3 = jnp.zeros((OUTPUT_DIM,), jnp.float32)
    return (w1, b1, w2, b2, w3, b3)


@functools.partial(jax.jit, static_argnames=("force_tiled",))
def gcn_forward(x, a_hat, params, dropout_masks=None, *, force_tiled=False):
    """out = conv3(drop(relu(conv2(drop(relu(conv1(x))))))) with dense A_hat."""
    w1, b1, w2, b2, w3, b3 = params
    n = x.shape[0]
    n_pad = max(_round_up(n, NODE_PAD), NODE_PAD)

    # Minimal, lane-friendly padding; padded rows/cols of A_hat are zero so real rows
    # never mix padding in.  Padded results are sliced off at the end.
    x_p = _pad2(x, n_pad, FIN_P)
    a_p = _pad2(a_hat, n_pad, n_pad)
    w1_p = _pad2(w1, FIN_P, HIDDEN_DIM)
    w3_p = _pad2(w3, HIDDEN_DIM, OUT_P)
    b1_p = b1[None, :]
    b2_p = b2[None, :]
    b3_p = _pad2(b3[None, :], 1, OUT_P)

    if dropout_masks is None:
        m1_p = m2_p = None
        masks_p = None
    else:
        m1, m2 = dropout_masks
        m1_p = _pad2(m1, n_pad, HIDDEN_DIM)
        m2_p = _pad2(m2, n_pad, HIDDEN_DIM)
        masks_p = (m1_p, m2_p)

    if (n_pad <= RESIDENT_MAX_NODES) and not force_tiled:
        out_p = _gcn_forward_resident(a_p, x_p, w1_p, b1_p, w2, b2_p, w3_p, b3_p, masks_p)
    else:
        h1 = _gcn_layer_tiled(a_p, x_p, w1_p, b1_p, m1_p,
                              apply_relu=True, out_dtype=jnp.bfloat16)
        h2 = _gcn_layer_tiled(a_p, h1, w2, b2_p, m2_p,
                              apply_relu=True, out_dtype=jnp.bfloat16)
        out_p = _gcn_layer_tiled(a_p, h2, w3_p, b3_p, None,
                                 apply_relu=False, out_dtype=jnp.float32)

    return out_p[:n, :OUTPUT_DIM]


def reference_forward(x, a_hat, params, dropout_masks=None):
    """Pure-JAX reference (f32 math, same bf16 A_hat) for tolerance checks."""
    w1, b1, w2, b2, w3, b3 = params
    a = a_hat.astype(jnp.float32)
    h = jnp.maximum(a @ (x @ w1) + b1, 0.0)
    if dropout_masks is not None:
        h = h * dropout_masks[0].astype(jnp.float32)
    h = jnp.maximum(a @ (h @ w2) + b2, 0.0)
    if dropout_masks is not None:
        h = h * dropout_masks[1].astype(jnp.float32)
    return a @ (h @ w3) + b3


if __name__ == "__main__":
    num_nodes = 16  # small synthetic node count

    key = jax.random.PRNGKey(0)
    k_x, k_p, k_d = jax.random.split(key, 3)

    # node features (N, 6), like torch.tensor(df[features].values, dtype=torch.float)
    x = jax.random.normal(k_x, (num_nodes, INPUT_DIM), jnp.float32)

    # edges = []  ->  edge_index of shape (2, 0)  ->  A_hat = I
    edge_index = jnp.empty((2, 0), dtype=jnp.int32)
    a_hat = build_normalized_adjacency(edge_index, num_nodes)

    params = init_params(k_p)
    dropout_masks = make_dropout_masks(k_d, num_nodes)

    # Training-mode forward (nn.Module default): single fused VMEM-resident kernel.
    out_train = gcn_forward(x, a_hat, params, dropout_masks)
    jax.block_until_ready(out_train)
    assert out_train.shape == (num_nodes, OUTPUT_DIM)
    assert bool(jnp.all(jnp.isfinite(out_train)))
    ref_train = reference_forward(x, a_hat, params, dropout_masks)
    assert bool(jnp.allclose(out_train, ref_train, rtol=5e-2, atol=5e-2))

    # Eval-mode forward via both paths (resident + forced tiled) vs pure-JAX reference.
    ref_eval = reference_forward(x, a_hat, params)
    out_res = gcn_forward(x, a_hat, params, None)
    out_tiled = gcn_forward(x, a_hat, params, None, force_tiled=True)
    for o in (out_res, out_tiled):
        jax.block_until_ready(o)
        assert o.shape == (num_nodes, OUTPUT_DIM)
        assert bool(jnp.allclose(o, ref_eval, rtol=5e-2, atol=5e-2))

    print("KERNEL_OK")
</pallas_src>

<mosaic_0001>
module attributes {stable_mosaic.version = 11 : i64} {
  func.func @gcn_resident_kernel(%arg0: i32, %arg1: memref<256x256xbf16, #tpu.memory_space<vmem>>, %arg2: memref<256x8xf32, #tpu.memory_space<vmem>>, %arg3: memref<8x32xf32, #tpu.memory_space<vmem>>, %arg4: memref<1x32xf32, #tpu.memory_space<vmem>>, %arg5: memref<32x32xf32, #tpu.memory_space<vmem>>, %arg6: memref<1x32xf32, #tpu.memory_space<vmem>>, %arg7: memref<32x8xf32, #tpu.memory_space<vmem>>, %arg8: memref<1x8xf32, #tpu.memory_space<vmem>>, %arg9: memref<256x32xbf16, #tpu.memory_space<vmem>>, %arg10: memref<256x32xbf16, #tpu.memory_space<vmem>>, %arg11: memref<256x8xf32, #tpu.memory_space<vmem>>) attributes {dimension_semantics = [#tpu.dimension_semantics<arbitrary>], iteration_bounds = array<i64: 1>, scalar_prefetch = 0 : i64, scratch_operands = 0 : i64, tpu.core_type = #tpu.core_type<tc>, window_params = [{pipeline_mode = #tpu.pipeline_mode<synchronous>, transform_indices = @transform_0, window_bounds = array<i64: 256, 256>}, {pipeline_mode = #tpu.pipeline_mode<synchronous>, transform_indices = @transform_1, window_bounds = array<i64: 256, 8>}, {pipeline_mode = #tpu.pipeline_mode<synchronous>, transform_indices = @transform_2, window_bounds = array<i64: 8, 32>}, {pipeline_mode = #tpu.pipeline_mode<synchronous>, transform_indices = @transform_3, window_bounds = array<i64: 1, 32>}, {pipeline_mode = #tpu.pipeline_mode<synchronous>, transform_indices = @transform_4, window_bounds = array<i64: 32, 32>}, {pipeline_mode = #tpu.pipeline_mode<synchronous>, transform_indices = @transform_5, window_bounds = array<i64: 1, 32>}, {pipeline_mode = #tpu.pipeline_mode<synchronous>, transform_indices = @transform_6, window_bounds = array<i64: 32, 8>}, {pipeline_mode = #tpu.pipeline_mode<synchronous>, transform_indices = @transform_7, window_bounds = array<i64: 1, 8>}, {pipeline_mode = #tpu.pipeline_mode<synchronous>, transform_indices = @transform_8, window_bounds = array<i64: 256, 32>}, {pipeline_mode = #tpu.pipeline_mode<synchronous>, transform_indices = @transform_9, window_bounds = array<i64: 256, 32>}, {pipeline_mode = #tpu.pipeline_mode<synchronous>, transform_indices = @transform_10, window_bounds = array<i64: 256, 8>}]} {
    %c0 = arith.constant 0 : index
    %c0_0 = arith.constant 0 : index
    %0 = vector.load %arg2[%c0, %c0_0] : memref<256x8xf32, #tpu.memory_space<vmem>>, vector<256x8xf32>
    %c0_1 = arith.constant 0 : index
    %c0_2 = arith.constant 0 : index
    %1 = vector.load %arg3[%c0_1, %c0_2] : memref<8x32xf32, #tpu.memory_space<vmem>>, vector<8x32xf32>
    %cst = arith.constant dense<0.000000e+00> : vector<256x32xf32>
    %2 = tpu.matmul %0, %1, %cst {dimension_numbers = #tpu.dot_dimension_numbers<[1], [0], [0], [1], [0, 0, 1, 1], [], []>} : vector<256x8xf32>, vector<8x32xf32>, vector<256x32xf32> -> vector<256x32xf32>
    %c0_3 = arith.constant 0 : index
    %c0_4 = arith.constant 0 : index
    %3 = vector.load %arg1[%c0_3, %c0_4] : memref<256x256xbf16, #tpu.memory_space<vmem>>, vector<256x256xbf16>
    %4 = arith.truncf %2 : vector<256x32xf32> to vector<256x32xbf16>
    %cst_5 = arith.constant dense<0.000000e+00> : vector<256x32xf32>
    %5 = tpu.matmul %3, %4, %cst_5 {dimension_numbers = #tpu.dot_dimension_numbers<[1], [0], [0], [1], [0, 0, 1, 1], [], []>} : vector<256x256xbf16>, vector<256x32xbf16>, vector<256x32xf32> -> vector<256x32xf32>
    %c0_6 = arith.constant 0 : index
    %c0_7 = arith.constant 0 : index
    %6 = vector.load %arg4[%c0_6, %c0_7] : memref<1x32xf32, #tpu.memory_space<vmem>>, vector<1x32xf32>
    %7 = vector.broadcast %6 : vector<1x32xf32> to vector<256x32xf32>
    %8 = arith.addf %5, %7 : vector<256x32xf32>
    %cst_8 = arith.constant 0.000000e+00 : f32
    %9 = vector.broadcast %cst_8 : f32 to vector<256x32xf32>
    %10 = arith.maximumf %8, %9 : vector<256x32xf32>
    %c0_9 = arith.constant 0 : index
    %c0_10 = arith.constant 0 : index
    %11 = vector.load %arg9[%c0_9, %c0_10] : memref<256x32xbf16, #tpu.memory_space<vmem>>, vector<256x32xbf16>
    %12 = arith.extf %11 : vector<256x32xbf16> to vector<256x32xf32>
    %13 = arith.mulf %10, %12 : vector<256x32xf32>
    %c0_11 = arith.constant 0 : index
    %c0_12 = arith.constant 0 : index
    %14 = vector.load %arg5[%c0_11, %c0_12] : memref<32x32xf32, #tpu.memory_space<vmem>>, vector<32x32xf32>
    %cst_13 = arith.constant dense<0.000000e+00> : vector<256x32xf32>
    %15 = tpu.matmul %13, %14, %cst_13 {dimension_numbers = #tpu.dot_dimension_numbers<[1], [0], [0], [1], [0, 0, 1, 1], [], []>} : vector<256x32xf32>, vector<32x32xf32>, vector<256x32xf32> -> vector<256x32xf32>
    %c0_14 = arith.constant 0 : index
    %c0_15 = arith.constant 0 : index
    %16 = vector.load %arg1[%c0_14, %c0_15] : memref<256x256xbf16, #tpu.memory_space<vmem>>, vector<256x256xbf16>
    %17 = arith.truncf %15 : vector<256x32xf32> to vector<256x32xbf16>
    %cst_16 = arith.constant dense<0.000000e+00> : vector<256x32xf32>
    %18 = tpu.matmul %16, %17, %cst_16 {dimension_numbers = #tpu.dot_dimension_numbers<[1], [0], [0], [1], [0, 0, 1, 1], [], []>} : vector<256x256xbf16>, vector<256x32xbf16>, vector<256x32xf32> -> vector<256x32xf32>
    %c0_17 = arith.constant 0 : index
    %c0_18 = arith.constant 0 : index
    %19 = vector.load %arg6[%c0_17, %c0_18] : memref<1x32xf32, #tpu.memory_space<vmem>>, vector<1x32xf32>
    %20 = vector.broadcast %19 : vector<1x32xf32> to vector<256x32xf32>
    %21 = arith.addf %18, %20 : vector<256x32xf32>
    %cst_19 = arith.constant 0.000000e+00 : f32
    %22 = vector.broadcast %cst_19 : f32 to vector<256x32xf32>
    %23 = arith.maximumf %21, %22 : vector<256x32xf32>
    %c0_20 = arith.constant 0 : index
    %c0_21 = arith.constant 0 : index
    %24 = vector.load %arg10[%c0_20, %c0_21] : memref<256x32xbf16, #tpu.memory_space<vmem>>, vector<256x32xbf16>
    %25 = arith.extf %24 : vector<256x32xbf16> to vector<256x32xf32>
    %26 = arith.mulf %23, %25 : vector<256x32xf32>
    %c0_22 = arith.constant 0 : index
    %c0_23 = arith.constant 0 : index
    %27 = vector.load %arg7[%c0_22, %c0_23] : memref<32x8xf32, #tpu.memory_space<vmem>>, vector<32x8xf32>
    %cst_24 = arith.constant dense<0.000000e+00> : vector<256x8xf32>
    %28 = tpu.matmul %26, %27, %cst_24 {dimension_numbers = #tpu.dot_dimension_numbers<[1], [0], [0], [1], [0, 0, 1, 1], [], []>} : vector<256x32xf32>, vector<32x8xf32>, vector<256x8xf32> -> vector<256x8xf32>
    %c0_25 = arith.constant 0 : index
    %c0_26 = arith.constant 0 : index
    %29 = vector.load %arg1[%c0_25, %c0_26] : memref<256x256xbf16, #tpu.memory_space<vmem>>, vector<256x256xbf16>
    %30 = arith.truncf %28 : vector<256x8xf32> to vector<256x8xbf16>
    %cst_27 = arith.constant dense<0.000000e+00> : vector<256x8xf32>
    %31 = tpu.matmul %29, %30, %cst_27 {dimension_numbers = #tpu.dot_dimension_numbers<[1], [0], [0], [1], [0, 0, 1, 1], [], []>} : vector<256x256xbf16>, vector<256x8xbf16>, vector<256x8xf32> -> vector<256x8xf32>
    %c0_28 = arith.constant 0 : index
    %c0_29 = arith.constant 0 : index
    %32 = vector.load %arg8[%c0_28, %c0_29] : memref<1x8xf32, #tpu.memory_space<vmem>>, vector<1x8xf32>
    %33 = vector.broadcast %32 : vector<1x8xf32> to vector<256x8xf32>
    %34 = arith.addf %31, %33 : vector<256x8xf32>
    %c0_30 = arith.constant 0 : index
    %c0_31 = arith.constant 0 : index
    %35 = vector.load %arg11[%c0_30, %c0_31] : memref<256x8xf32, #tpu.memory_space<vmem>>, vector<256x8xf32>
    tpu.vector_store %arg11[%c0_30, %c0_31], %34 {strides = array<i32>} : memref<256x8xf32, #tpu.memory_space<vmem>>, vector<256x8xf32>,
    return
  }
  func.func @transform_0(%arg0: i32) -> (i32, i32) {
    %c0_i32 = arith.constant 0 : i32
    %c0_i32_0 = arith.constant 0 : i32
    %c0_i32_1 = arith.constant 0 : i32
    return %c0_i32, %c0_i32_0 : i32, i32
  }
  func.func @transform_1(%arg0: i32) -> (i32, i32) {
    %c0_i32 = arith.constant 0 : i32
    %c0_i32_0 = arith.constant 0 : i32
    %c0_i32_1 = arith.constant 0 : i32
    return %c0_i32, %c0_i32_0 : i32, i32
  }
  func.func @transform_2(%arg0: i32) -> (i32, i32) {
    %c0_i32 = arith.constant 0 : i32
    %c0_i32_0 = arith.constant 0 : i32
    %c0_i32_1 = arith.constant 0 : i32
    return %c0_i32, %c0_i32_0 : i32, i32
  }
  func.func @transform_3(%arg0: i32) -> (i32, i32) {
    %c0_i32 = arith.constant 0 : i32
    %c0_i32_0 = arith.constant 0 : i32
    %c0_i32_1 = arith.constant 0 : i32
    return %c0_i32, %c0_i32_0 : i32, i32
  }
  func.func @transform_4(%arg0: i32) -> (i32, i32) {
    %c0_i32 = arith.constant 0 : i32
    %c0_i32_0 = arith.constant 0 : i32
    %c0_i32_1 = arith.constant 0 : i32
    return %c0_i32, %c0_i32_0 : i32, i32
  }
  func.func @transform_5(%arg0: i32) -> (i32, i32) {
    %c0_i32 = arith.constant 0 : i32
    %c0_i32_0 = arith.constant 0 : i32
    %c0_i32_1 = arith.constant 0 : i32
    return %c0_i32, %c0_i32_0 : i32, i32
  }
  func.func @transform_6(%arg0: i32) -> (i32, i32) {
    %c0_i32 = arith.constant 0 : i32
    %c0_i32_0 = arith.constant 0 : i32
    %c0_i32_1 = arith.constant 0 : i32
    return %c0_i32, %c0_i32_0 : i32, i32
  }
  func.func @transform_7(%arg0: i32) -> (i32, i32) {
    %c0_i32 = arith.constant 0 : i32
    %c0_i32_0 = arith.constant 0 : i32
    %c0_i32_1 = arith.constant 0 : i32
    return %c0_i32, %c0_i32_0 : i32, i32
  }
  func.func @transform_8(%arg0: i32) -> (i32, i32) {
    %c0_i32 = arith.constant 0 : i32
    %c0_i32_0 = arith.constant 0 : i32
    %c0_i32_1 = arith.constant 0 : i32
    return %c0_i32, %c0_i32_0 : i32, i32
  }
  func.func @transform_9(%arg0: i32) -> (i32, i32) {
    %c0_i32 = arith.constant 0 : i32
    %c0_i32_0 = arith.constant 0 : i32
    %c0_i32_1 = arith.constant 0 : i32
    return %c0_i32, %c0_i32_0 : i32, i32
  }
  func.func @transform_10(%arg0: i32) -> (i32, i32) {
    %c0_i32 = arith.constant 0 : i32
    %c0_i32_0 = arith.constant 0 : i32
    %c0_i32_1 = arith.constant 0 : i32
    return %c0_i32, %c0_i32_0 : i32, i32
  }
}

</mosaic_0001>

<bundles_post_ra>
// kernel: gcn_forward.1
= control target key start
LH: loop header
LB: loop body
LE: loop exit
PB: predicated region body
PF: predicated region fallthrough
CT: control target
= control target key end

     0   :  { %vm69_vm0 = vcmask 64512   ;;  %vm899_vm1 = vcmask 261120   ;;  %s4039_s2 = inlined_call_operand.vmem [shape: f32[8,32], index: 2, kind: input, shape index: {}]   ;;  %s4040_s1 = inlined_call_operand.vmem [shape: f32[256,8], index: 1, kind: input, shape index: {}]   ;;  %s4041_s0 = inlined_call_operand.vmem [shape: bf16[256,256], index: 0, kind: input, shape index: {}]   ;;  %s4042_s4 = inlined_call_operand.vmem [shape: f32[32,32], index: 4, kind: input, shape index: {}]   ;;  %s4043_s3 = inlined_call_operand.vmem [shape: f32[1,32], index: 3, kind: input, shape index: {}]   ;;  %s4044_s8 = inlined_call_operand.vmem [shape: bf16[256,32], index: 8, kind: input, shape index: {}]   ;;  %s4045_s6 = inlined_call_operand.vmem [shape: f32[32,8], index: 6, kind: input, shape index: {}]   ;;  %s4046_s5 = inlined_call_operand.vmem [shape: f32[1,32], index: 5, kind: input, shape index: {}]   ;;  %s4047_s9 = inlined_call_operand.vmem [shape: bf16[256,32], index: 9, kind: input, shape index: {}]   ;;  %s4048_s7 = inlined_call_operand.vmem [shape: f32[1,8], index: 7, kind: input, shape index: {}]   ;;  %s4049_s10 = inlined_call_operand.vmem [shape: f32[256,8], index: 10, kind: output, shape index: {}]  }
   0x1   :  { %v68_v0 = vld [vmem:[%s4039_s2] sm:$0xff]  ;;  %v37_v2 = vld [vmem:[%s4040_s1 + $0x8] sm:$0xff]  ;;  %v38_v3 = vld [vmem:[%s4040_s1 + $0x10] sm:$0xff] }
   0x2   :  { %v36_v1 = vld [vmem:[%s4040_s1] sm:$0xff]  ;;  %2808 = vmatprep.subr.mxu0 %v68_v0  ;;  %v39_v4 = vld [vmem:[%s4040_s1 + $0x18] sm:$0xff]  ;;  %v41_v6 = vld [vmem:[%s4040_s1 + $0x28] sm:$0xff] }
   0x3   :  { %2810 = vmatprep.mubr.msk.f32.mxu0 %vm69_vm0, %v36_v1  ;;  %2809 = vmatpush3.msra.mxu0 %v68_v0  ;;  %v40_v5 = vld [vmem:[%s4040_s1 + $0x20] sm:$0xff]  ;;  %v42_v7 = vld [vmem:[%s4040_s1 + $0x30] sm:$0xff]  ;;  %v43_v8 = vld [vmem:[%s4040_s1 + $0x38] sm:$0xff] }
   0x4   :  { %2811 = vmatmul.mubr.msk.f32.vlgmr.msra.gmra.mrb[0].mxu0 %vm69_vm0, %v37_v2  ;;  %v44_v9 = vld [vmem:[%s4040_s1 + $0x40] sm:$0xff]  ;;  %v45_v10 = vld [vmem:[%s4040_s1 + $0x48] sm:$0xff]  ;;  %v46_v11 = vld [vmem:[%s4040_s1 + $0x50] sm:$0xff] }
   0x5   :  { %2813 = vmatprep.mubr.msk.f32.mxu0 %vm69_vm0, %v38_v3  ;;  %v47_v12 = vld [vmem:[%s4040_s1 + $0x58] sm:$0xff]  ;;  %v48_v13 = vld [vmem:[%s4040_s1 + $0x60] sm:$0xff]  ;;  %v49_v14 = vld [vmem:[%s4040_s1 + $0x68] sm:$0xff] }
   0x6   :  { %v50_v15 = vld [vmem:[%s4040_s1 + $0x70] sm:$0xff]  ;;  %v51_v16 = vld [vmem:[%s4040_s1 + $0x78] sm:$0xff]  ;;  %v52_v17 = vld [vmem:[%s4040_s1 + $0x80] sm:$0xff] }
   0x7   :  { %v53_v18 = vld [vmem:[%s4040_s1 + $0x88] sm:$0xff]  ;;  %v54_v19 = vld [vmem:[%s4040_s1 + $0x90] sm:$0xff]  ;;  %v55_v20 = vld [vmem:[%s4040_s1 + $0x98] sm:$0xff] }
   0x8   :  { %2814 = vmatmul.mubr.msk.f32.gmra.mrb[2].mxu0 %vm69_vm0, %v39_v4  ;;  %v56_v21 = vld [vmem:[%s4040_s1 + $0xa0] sm:$0xff]  ;;  %v57_v22 = vld [vmem:[%s4040_s1 + $0xa8] sm:$0xff]  ;;  %v58_v23 = vld [vmem:[%s4040_s1 + $0xb0] sm:$0xff] }
   0x9   :  { %2816 = vmatprep.mubr.msk.f32.mxu0 %vm69_vm0, %v40_v5  ;;  %v59_v24 = vld [vmem:[%s4040_s1 + $0xb8] sm:$0xff]  ;;  %v60_v25 = vld [vmem:[%s4040_s1 + $0xc0] sm:$0xff]  ;;  %v61_v26 = vld [vmem:[%s4040_s1 + $0xc8] sm:$0xff] }
   0xa   :  { %v62_v27 = vld [vmem:[%s4040_s1 + $0xd0] sm:$0xff]  ;;  %v63_v28 = vld [vmem:[%s4040_s1 + $0xd8] sm:$0xff]  ;;  %v64_v29 = vld [vmem:[%s4040_s1 + $0xe0] sm:$0xff] }
   0xb   :  { %v65_v30 = vld [vmem:[%s4040_s1 + $0xe8] sm:$0xff]  ;;  %v66_v31 = vld [vmem:[%s4040_s1 + $0xf0] sm:$0xff]  ;;  %v67_v32 = vld [vmem:[%s4040_s1 + $0xf8] sm:$0xff] }
   0xc   :  { %2817 = vmatmul.mubr.msk.f32.gmra.mrb[4].mxu0 %vm69_vm0, %v41_v6  ;;  %v3275_v33 = vld [vmem:[%s4041_s0 + $0x4] ss:$8 sps:$4 sm:$0xff]   ;;  %v3009_v34 = vld [vmem:[%s4041_s0 + $0x54] ss:$8 sps:$4 sm:$0xff]  }
   0xd   :  { %2819 = vmatprep.mubr.msk.f32.mxu0 %vm69_vm0, %v42_v7  ;;  %678 = vmatprep.mubr.bf16.mxu1 %v3009_v34  ;;  %v3366_v34 = vld [vmem:[%s4041_s0 + $0x44] ss:$8 sps:$4 sm:$0xff]  }
  0x10   :  { %2820 = vmatmul.mubr.msk.f32.gmra.mrb[6].mxu0 %vm69_vm0, %v43_v8 }
  0x11   :  { %2822 = vmatprep.mubr.msk.f32.mxu0 %vm69_vm0, %v44_v9 }
  0x14   :  { %2823 = vmatmul.mubr.msk.f32.gmra.mrb[8].mxu0 %vm69_vm0, %v45_v10 }
  0x15   :  { %2825 = vmatprep.mubr.msk.f32.mxu0 %vm69_vm0, %v46_v11 }
  0x18   :  { %2826 = vmatmul.mubr.msk.f32.gmra.mrb[10].mxu0 %vm69_vm0, %v47_v12 }
  0x19   :  { %2828 = vmatprep.mubr.msk.f32.mxu0 %vm69_vm0, %v48_v13 }
  0x1c   :  { %2829 = vmatmul.mubr.msk.f32.gmra.mrb[12].mxu0 %vm69_vm0, %v49_v14 }
  0x1d   :  { %2831 = vmatprep.mubr.msk.f32.mxu0 %vm69_vm0, %v50_v15 }
  0x20   :  { %2832 = vmatmul.mubr.msk.f32.gmra.mrb[14].mxu0 %vm69_vm0, %v51_v16 }
  0x21   :  { %2834 = vmatprep.mubr.msk.f32.mxu0 %vm69_vm0, %v52_v17 }
  0x24   :  { %2835 = vmatmul.mubr.msk.f32.gmra.mrb[16].mxu0 %vm69_vm0, %v53_v18 }
  0x25   :  { %2837 = vmatprep.mubr.msk.f32.mxu0 %vm69_vm0, %v54_v19  ;;  %v3284_v19 = vld [vmem:[%s4041_s0] ss:$8 sps:$4 sm:$0xff]  }
  0x28   :  { %2838 = vmatmul.mubr.msk.f32.gmra.mrb[18].mxu0 %vm69_vm0, %v55_v20  ;;  %v3289_v20 = vld [vmem:[%s4041_s0 + $0x50] ss:$8 sps:$4 sm:$0xff]  }
  0x29   :  { %2840 = vmatprep.mubr.msk.f32.mxu0 %vm69_vm0, %v56_v21  ;;  %v3294_v21 = vld [vmem:[%s4041_s0 + $0x14] ss:$8 sps:$4 sm:$0xff]  }
  0x2c   :  { %2841 = vmatmul.mubr.msk.f32.gmra.mrb[20].mxu0 %vm69_vm0, %v57_v22  ;;  %v3299_v22 = vld [vmem:[%s4041_s0 + $0x64] ss:$8 sps:$4 sm:$0xff]  }
  0x2d   :  { %2843 = vmatprep.mubr.msk.f32.mxu0 %vm69_vm0, %v58_v23  ;;  %v3308_v23 = vld [vmem:[%s4041_s0 + $0x10] ss:$8 sps:$4 sm:$0xff]  }
  0x30   :  { %2844 = vmatmul.mubr.msk.f32.gmra.mrb[22].mxu0 %vm69_vm0, %v59_v24  ;;  %v3313_v24 = vld [vmem:[%s4041_s0 + $0x60] ss:$8 sps:$4 sm:$0xff]  }
  0x31   :  { %2846 = vmatprep.mubr.msk.f32.mxu0 %vm69_vm0, %v60_v25  ;;  %v3318_v25 = vld [vmem:[%s4041_s0 + $0x24] ss:$8 sps:$4 sm:$0xff]  }
  0x34   :  { %2847 = vmatmul.mubr.msk.f32.gmra.mrb[24].mxu0 %vm69_vm0, %v61_v26  ;;  %v3323_v26 = vld [vmem:[%s4041_s0 + $0x74] ss:$8 sps:$4 sm:$0xff]  }
  0x35   :  { %2849 = vmatprep.mubr.msk.f32.mxu0 %vm69_vm0, %v62_v27  ;;  %v3332_v27 = vld [vmem:[%s4041_s0 + $0x20] ss:$8 sps:$4 sm:$0xff]  }
  0x38   :  { %2850 = vmatmul.mubr.msk.f32.gmra.mrb[26].mxu0 %vm69_vm0, %v63_v28  ;;  %v3337_v28 = vld [vmem:[%s4041_s0 + $0x70] ss:$8 sps:$4 sm:$0xff]  }
  0x39   :  { %2852 = vmatprep.mubr.msk.f32.mxu0 %vm69_vm0, %v64_v29  ;;  %v3342_v29 = vld [vmem:[%s4041_s0 + $0x34] ss:$8 sps:$4 sm:$0xff]  }
  0x3c   :  { %2853 = vmatmul.mubr.msk.f32.gmra.mrb[28].mxu0 %vm69_vm0, %v65_v30  ;;  %v3347_v30 = vld [vmem:[%s4041_s0 + $0x84] ss:$8 sps:$4 sm:$0xff]  }
  0x3d   :  { %2855 = vmatprep.mubr.msk.f32.mxu0 %vm69_vm0, %v66_v31  ;;  %v3356_v31 = vld [vmem:[%s4041_s0 + $0x30] ss:$8 sps:$4 sm:$0xff]  }
  0x40   :  { %2856 = vmatmul.mubr.msk.f32.gmra.mrb[30].mxu0 %vm69_vm0, %v67_v32  ;;  %v3361_v32 = vld [vmem:[%s4041_s0 + $0x80] ss:$8 sps:$4 sm:$0xff]  }
  0x41   :  { %638 = vmatprep.mubr.bf16.mxu0 %v3275_v33 }
  0xd7   :  { %v2812_v35 = vpop.f32.mrb[0].mxu0 }
  0xd8   :  { %v232_v36 = vpop.f32.mrb[1].mxu0 }
  0xd9   :  { %v423_v37 = vpack.c.bf16 %v2812_v35, %v232_v36  ;;  %v3371_v35 = vld [vmem:[%s4041_s0 + $0x94] ss:$8 sps:$4 sm:$0xff]   ;;  %v3380_v36 = vld [vmem:[%s4041_s0 + $0x40] ss:$8 sps:$4 sm:$0xff]  }
  0xdb   :  { %v2815_v38 = vpop.f32.mrb[2].mxu0 }
  0xdc   :  { %v242_v39 = vpop.f32.mrb[3].mxu0 }
  0xdd   :  { %v424_v40 = vpack.c.bf16 %v2815_v38, %v242_v39  ;;  %v3390_v38 = vld [vmem:[%s4041_s0 + $0xa4] ss:$8 sps:$4 sm:$0xff]   ;;  %v3398_v39 = vld [vmem:[%s4041_s0 + $0xa0] ss:$8 sps:$4 sm:$0xff]  }
  0xdf   :  { %v2818_v41 = vpop.f32.mrb[4].mxu0 }
  0xe0   :  { %v252_v42 = vpop.f32.mrb[5].mxu0 }
  0xe1   :  { %v425_v43 = vpack.c.bf16 %v2818_v41, %v252_v42  ;;  %v3410_v41 = vld [vmem:[%s4041_s0 + $0xb0] ss:$8 sps:$4 sm:$0xff]   ;;  %v3415_v42 = vld [vmem:[%s4041_s0 + $0xc4] ss:$8 sps:$4 sm:$0xff]  }
  0xe3   :  { %v2821_v44 = vpop.f32.mrb[6].mxu0 }
  0xe4   :  { %v262_v45 = vpop.f32.mrb[7].mxu0 }
  0xe5   :  { %v426_v46 = vpack.c.bf16 %v2821_v44, %v262_v45  ;;  %v3427_v44 = vld [vmem:[%s4041_s0 + $0xd4] ss:$8 sps:$4 sm:$0xff]   ;;  %v3434_v45 = vld [vmem:[%s4041_s0 + $0xd0] ss:$8 sps:$4 sm:$0xff]  }
  0xe7   :  { %v2824_v47 = vpop.f32.mrb[8].mxu0 }
  0xe8   :  { %v272_v48 = vpop.f32.mrb[9].mxu0 }
  0xe9   :  { %v427_v49 = vpack.c.bf16 %v2824_v47, %v272_v48  ;;  %v3446_v47 = vld [vmem:[%s4041_s0 + $0xe0] ss:$8 sps:$4 sm:$0xff]   ;;  %v3451_v48 = vld [vmem:[%s4041_s0 + $0xf4] ss:$8 sps:$4 sm:$0xff]  }
  0xeb   :  { %v2827_v50 = vpop.f32.mrb[10].mxu0 }
  0xec   :  { %v282_v51 = vpop.f32.mrb[11].mxu0 }
  0xed   :  { %v428_v52 = vpack.c.bf16 %v2827_v50, %v282_v51  ;;  %v895_v50 = vld [vmem:[%s4042_s4] sm:$0xff]  ;;  %v896_v51 = vld [vmem:[%s4042_s4 + $0x8] sm:$0xff] }
  0xef   :  { %v2830_v53 = vpop.f32.mrb[12].mxu0 }
  0xf0   :  { %v292_v54 = vpop.f32.mrb[13].mxu0 }
  0xf1   :  { %v429_v55 = vpack.c.bf16 %v2830_v53, %v292_v54  ;;  %v897_v53 = vld [vmem:[%s4042_s4 + $0x10] sm:$0xff]  ;;  %v898_v54 = vld [vmem:[%s4042_s4 + $0x18] sm:$0xff] }
  0xf3   :  { %v2833_v56 = vpop.f32.mrb[14].mxu0 }
  0xf4   :  { %v302_v57 = vpop.f32.mrb[15].mxu0 }
  0xf5   :  { %v430_v58 = vpack.c.bf16 %v2833_v56, %v302_v57 }
  0xf7   :  { %v2836_v59 = vpop.f32.mrb[16].mxu0 }
  0xf8   :  { %v312_v60 = vpop.f32.mrb[17].mxu0 }
  0xf9   :  { %v431_v61 = vpack.c.bf16 %v2836_v59, %v312_v60  ;;  %v2210_v60 = vld [vmem:[%s4044_s8] sm:$0xff]  }
  0xfb   :  { %v2839_v62 = vpop.f32.mrb[18].mxu0  ;;  %2400 = vmatprep.subr.bf16.mxu0 %v431_v61  ;;  %2986 = vmatprep.subr.bf16.mxu1 %v431_v61 }
  0xfc   :  { %v322_v63 = vpop.f32.mrb[19].mxu0  ;;  %2401 = vmatpush3.bf16.msra.mxu0 %v423_v37  ;;  %2994 = vmatpush3.bf16.msra.mxu1 %v423_v37  ;;  %v3385_v37 = vld [vmem:[%s4041_s0 + $0x90] ss:$8 sps:$4 sm:$0xff]  }
  0xfd   :  { %v432_v0 = vpack.c.bf16 %v2839_v62, %v322_v63 }
  0xff   :  { %v2842_v1 = vpop.f32.mrb[20].mxu0  ;;  %2402 = vmatprep.subr.bf16.mxu0 %v432_v0  ;;  %2987 = vmatprep.subr.bf16.mxu1 %v432_v0 }
 0x100   :  { %v332_v2 = vpop.f32.mrb[21].mxu0  ;;  %2403 = vmatpush3.bf16.msra.mxu0 %v424_v40  ;;  %2995 = vmatpush3.bf16.msra.mxu1 %v424_v40  ;;  %v3403_v40 = vld [vmem:[%s4041_s0 + $0xb4] ss:$8 sps:$4 sm:$0xff]  }
 0x101   :  { %v433_v3 = vpack.c.bf16 %v2842_v1, %v332_v2 }
 0x103   :  { %v2845_v4 = vpop.f32.mrb[22].mxu0  ;;  %2404 = vmatprep.subr.bf16.mxu0 %v433_v3  ;;  %2988 = vmatprep.subr.bf16.mxu1 %v433_v3 }
 0x104   :  { %v342_v5 = vpop.f32.mrb[23].mxu0  ;;  %2405 = vmatpush3.bf16.msra.mxu0 %v425_v43  ;;  %2996 = vmatpush3.bf16.msra.mxu1 %v425_v43  ;;  %v3422_v43 = vld [vmem:[%s4041_s0 + $0xc0] ss:$8 sps:$4 sm:$0xff]  }
 0x105   :  { %v434_v6 = vpack.c.bf16 %v2845_v4, %v342_v5  ;;  %v2211_v5 = vunpack.c.l.bf16 %v2210_v60 }
 0x107   :  { %v2848_v7 = vpop.f32.mrb[24].mxu0  ;;  %2406 = vmatprep.subr.bf16.mxu0 %v434_v6  ;;  %2989 = vmatprep.subr.bf16.mxu1 %v434_v6 }
 0x108   :  { %v352_v8 = vpop.f32.mrb[25].mxu0  ;;  %2407 = vmatpush3.bf16.msra.mxu0 %v426_v46  ;;  %2997 = vmatpush3.bf16.msra.mxu1 %v426_v46  ;;  %v3439_v46 = vld [vmem:[%s4041_s0 + $0xe4] ss:$8 sps:$4 sm:$0xff]  }
 0x109   :  { %v435_v9 = vpack.c.bf16 %v2848_v7, %v352_v8 }
 0x10b   :  { %v2851_v10 = vpop.f32.mrb[26].mxu0  ;;  %2408 = vmatprep.subr.bf16.mxu0 %v435_v9  ;;  %2990 = vmatprep.subr.bf16.mxu1 %v435_v9 }
 0x10c   :  { %v362_v11 = vpop.f32.mrb[27].mxu0  ;;  %2409 = vmatpush3.bf16.msra.mxu0 %v427_v49  ;;  %2998 = vmatpush3.bf16.msra.mxu1 %v427_v49  ;;  %v3458_v49 = vld [vmem:[%s4041_s0 + $0xf0] ss:$8 sps:$4 sm:$0xff]  }
 0x10d   :  { %v436_v12 = vpack.c.bf16 %v2851_v10, %v362_v11  ;;  %v2212_v10 = vunpack.c.h.bf16 %v2210_v60 }
 0x10f   :  { %v2854_v13 = vpop.f32.mrb[28].mxu0  ;;  %2410 = vmatprep.subr.bf16.mxu0 %v436_v12  ;;  %2991 = vmatprep.subr.bf16.mxu1 %v436_v12 }
 0x110   :  { %v372_v14 = vpop.f32.mrb[29].mxu0  ;;  %2411 = vmatpush3.bf16.msra.mxu0 %v428_v52  ;;  %2999 = vmatpush3.bf16.msra.mxu1 %v428_v52  ;;  %v2970_v52 = vpack.c.bf16 %v896_v51, %v895_v50 }
 0x111   :  { %v437_v15 = vpack.c.bf16 %v2854_v13, %v372_v14 }
 0x113   :  { %v2857_v16 = vpop.f32.mrb[30].mxu0  ;;  %2412 = vmatprep.subr.bf16.mxu0 %v437_v15  ;;  %2992 = vmatprep.subr.bf16.mxu1 %v437_v15 }
 0x114   :  { %v382_v17 = vpop.f32.mrb[31].mxu0  ;;  %2413 = vmatpush3.bf16.msra.mxu0 %v429_v55  ;;  %3000 = vmatpush3.bf16.msra.mxu1 %v429_v55  ;;  %v2974_v55 = vpack.c.bf16 %v898_v54, %v897_v53 }
 0x115   :  { %v438_v18 = vpack.c.bf16 %v2857_v16, %v382_v17  ;;  %v2337_v16 = vld [vmem:[%s4044_s8 + $0x8] sm:$0xff]  }
 0x117   :  { %2414 = vmatprep.subr.bf16.mxu0 %v438_v18  ;;  %2993 = vmatprep.subr.bf16.mxu1 %v438_v18 }
 0x118   :  { %2415 = vmatpush3.bf16.msra.mxu0 %v430_v58  ;;  %3001 = vmatpush3.bf16.msra.mxu1 %v430_v58  ;;  %v3476_v58 = vld [vmem:[%s4043_s3] ss:$0 sm:$0xff] }
 0x119   :  { %2971 = vmatprep.subr.bf16.mxu0 %v2970_v52 }
 0x11b   :  { %639 = vmatmul.mubr.bf16.vlgmr.msra.gmra.mrb[32].mxu0 %v3284_v19  ;;  %679 = vmatmul.mubr.bf16.vlgmr.msra.gmra.mrb[0].mxu1 %v3289_v20 }
 0x11c   :  { %646 = vmatprep.mubr.bf16.mxu0 %v3294_v21  ;;  %686 = vmatprep.mubr.bf16.mxu1 %v3299_v22 }
 0x11d   :  { %2973 = vmatpush3.bf16.msra.mxu0 %v2970_v52 }
 0x11e   :  { %2975 = vmatprep.subr.bf16.mxu0 %v2974_v55 }
 0x121   :  { %2977 = vmatpush3.bf16.msra.mxu0 %v2974_v55 }
 0x123   :  { %647 = vmatmul.mubr.bf16.gmra.mrb[36].mxu0 %v3308_v23  ;;  %687 = vmatmul.mubr.bf16.gmra.mrb[4].mxu1 %v3313_v24 }
 0x124   :  { %654 = vmatprep.mubr.bf16.mxu0 %v3318_v25  ;;  %694 = vmatprep.mubr.bf16.mxu1 %v3323_v26 }
 0x12b   :  { %655 = vmatmul.mubr.bf16.gmra.mrb[40].mxu0 %v3332_v27  ;;  %695 = vmatmul.mubr.bf16.gmra.mrb[8].mxu1 %v3337_v28 }
 0x12c   :  { %662 = vmatprep.mubr.bf16.mxu0 %v3342_v29  ;;  %702 = vmatprep.mubr.bf16.mxu1 %v3347_v30 }
 0x133   :  { %663 = vmatmul.mubr.bf16.gmra.mrb[44].mxu0 %v3356_v31  ;;  %703 = vmatmul.mubr.bf16.gmra.mrb[12].mxu1 %v3361_v32 }
 0x134   :  { %670 = vmatprep.mubr.bf16.mxu0 %v3366_v34  ;;  %710 = vmatprep.mubr.bf16.mxu1 %v3371_v35 }
 0x13b   :  { %671 = vmatmul.mubr.bf16.gmra.mrb[48].mxu0 %v3380_v36  ;;  %711 = vmatmul.mubr.bf16.gmra.mrb[16].mxu1 %v3385_v37 }
 0x13c   :  { %718 = vmatprep.mubr.bf16.mxu1 %v3390_v38 }
 0x143   :  { %719 = vmatmul.mubr.bf16.gmra.mrb[20].mxu1 %v3398_v39 }
 0x144   :  { %726 = vmatprep.mubr.bf16.mxu1 %v3403_v40 }
 0x14b   :  { %727 = vmatmul.mubr.bf16.gmra.mrb[24].mxu1 %v3410_v41 }
 0x14c   :  { %734 = vmatprep.mubr.bf16.mxu1 %v3415_v42 }
 0x153   :  { %735 = vmatmul.mubr.bf16.gmra.mrb[28].mxu1 %v3422_v43 }
 0x154   :  { %742 = vmatprep.mubr.bf16.mxu1 %v3427_v44 }
 0x15b   :  { %743 = vmatmul.mubr.bf16.gmra.mrb[32].mxu1 %v3434_v45 }
 0x15c   :  { %750 = vmatprep.mubr.bf16.mxu1 %v3439_v46 }
 0x163   :  { %751 = vmatmul.mubr.bf16.gmra.mrb[36].mxu1 %v3446_v47 }
 0x164   :  { %758 = vmatprep.mubr.bf16.mxu1 %v3451_v48 }
 0x16b   :  { %759 = vmatmul.mubr.bf16.gmra.mrb[40].mxu1 %v3458_v49 }
 0x1ee   :  { %v2416_v56 = vpop.f32.mrb[32].mxu0  ;;  %v2446_v57 = vpop.f32.mrb[0].mxu1 }
 0x1ef   :  { %v2417_v59 = vpop.f32.mrb[33].mxu0  ;;  %v2447_v61 = vpop.f32.mrb[1].mxu1 }
 0x1f0   :  { %v2418_v62 = vadd.f32 %v2417_v59, %v2416_v56  ;;  %v2419_v63 = vpop.f32.mrb[34].mxu0  ;;  %v3481_v0 = vadd.f32 %v2447_v61, %v2446_v57  ;;  %v2449_v1 = vpop.f32.mrb[2].mxu1  ;;  %v2215_v57 = vunpack.c.l.bf16 %v2337_v16 }
 0x1f1   :  { %v2420_v2 = vpop.f32.mrb[35].mxu0  ;;  %v2450_v3 = vpop.f32.mrb[3].mxu1 }
 0x1f2   :  { %v641_v4 = vadd.f32 %v2418_v62, %v3476_v58  ;;  %v2421_v6 = vadd.f32 %v2420_v2, %v2419_v63  ;;  %v3484_v7 = vadd.f32 %v2450_v3, %v2449_v1  ;;  %v2216_v63 = vunpack.c.h.bf16 %v2337_v16 }
 0x1f4   :  { %v767_v8 = vmax.f32 %v641_v4, 0.0  ;;  %v644_v9 = vadd.f32 %v2421_v6, %v3476_v58  ;;  %v2338_v6 = vld [vmem:[%s4044_s8 + $0x10] sm:$0xff]  }
 0x1f6   :  { %v863_v11 = vmul.f32 %v2211_v5, %v767_v8  ;;  %v768_v12 = vmax.f32 %v644_v9, 0.0  ;;  %v2422_v13 = vpop.f32.mrb[36].mxu0  ;;  %v2452_v14 = vpop.f32.mrb[4].mxu1 }
 0x1f7   :  { %v2423_v15 = vpop.f32.mrb[37].mxu0  ;;  %v2453_v17 = vpop.f32.mrb[5].mxu1 }
 0x1f8   :  { %v864_v18 = vmul.f32 %v2212_v10, %v768_v12  ;;  %v2424_v50 = vadd.f32 %v2423_v15, %v2422_v13  ;;  %v2425_v51 = vpop.f32.mrb[38].mxu0  ;;  %2866 = vmatprep.mubr.msk.f32.mxu0 %vm899_vm1, %v863_v11  ;;  %v3491_v52 = vadd.f32 %v2453_v17, %v2452_v14  ;;  %v2455_v53 = vpop.f32.mrb[6].mxu1  ;;  %v2219_v17 = vunpack.c.l.bf16 %v2338_v6 }
 0x1f9   :  { %v2426_v54 = vpop.f32.mrb[39].mxu0  ;;  %v2456_v55 = vpop.f32.mrb[7].mxu1 }
 0x1fa   :  { %v649_v56 = vadd.f32 %v2424_v50, %v3476_v58  ;;  %v2427_v59 = vadd.f32 %v2426_v54, %v2425_v51  ;;  %2867 = vmatmul.mubr.msk.f32.vlgmr.msra.gmra.mrb[52].mxu0 %vm899_vm1, %v864_v18  ;;  %v3495_v60 = vadd.f32 %v2456_v55, %v2455_v53  ;;  %v2220_v54 = vunpack.c.h.bf16 %v2338_v6 }
 0x1fc   :  { %v769_v61 = vmax.f32 %v649_v56, 0.0  ;;  %v652_v62 = vadd.f32 %v2427_v59, %v3476_v58 }
 0x1fe   :  { %v865_v1 = vmul.f32 %v2215_v57, %v769_v61  ;;  %v770_v2 = vmax.f32 %v652_v62, 0.0  ;;  %v2428_v3 = vpop.f32.mrb[40].mxu0  ;;  %v2458_v4 = vpop.f32.mrb[8].mxu1  ;;  %v2339_v62 = vld [vmem:[%s4044_s8 + $0x18] sm:$0xff]  }
 0x1ff   :  { %v2429_v5 = vpop.f32.mrb[41].mxu0  ;;  %v2459_v8 = vpop.f32.mrb[9].mxu1 }
 0x200   :  { %v866_v9 = vmul.f32 %v2216_v63, %v770_v2  ;;  %v2430_v10 = vadd.f32 %v2429_v5, %v2428_v3  ;;  %v2431_v11 = vpop.f32.mrb[42].mxu0  ;;  %2869 = vmatprep.mubr.msk.f32.mxu0 %vm899_vm1, %v865_v1  ;;  %v3502_v12 = vadd.f32 %v2459_v8, %v2458_v4  ;;  %v2461_v13 = vpop.f32.mrb[10].mxu1 }
 0x201   :  { %v2432_v14 = vpop.f32.mrb[43].mxu0  ;;  %v2462_v15 = vpop.f32.mrb[11].mxu1 }
 0x202   :  { %v657_v16 = vadd.f32 %v2430_v10, %v3476_v58  ;;  %v2433_v18 = vadd.f32 %v2432_v14, %v2431_v11  ;;  %2870 = vmatmul.mubr.msk.f32.gmra.mrb[54].mxu0 %vm899_vm1, %v866_v9  ;;  %v3506_v50 = vadd.f32 %v2462_v15, %v2461_v13  ;;  %v2223_v10 = vunpack.c.l.bf16 %v2339_v62 }
 0x204   :  { %v771_v51 = vmax.f32 %v657_v16, 0.0  ;;  %v660_v53 = vadd.f32 %v2433_v18, %v3476_v58  ;;  %v2224_v16 = vunpack.c.h.bf16 %v2339_v62  ;;  %v681_v62 = vadd.f32 %v3481_v0, %v3476_v58 }
 0x206   :  { %v867_v55 = vmul.f32 %v2219_v17, %v771_v51  ;;  %v772_v56 = vmax.f32 %v660_v53, 0.0  ;;  %v2434_v57 = vpop.f32.mrb[44].mxu0  ;;  %v2464_v59 = vpop.f32.mrb[12].mxu1 }
 0x207   :  { %v2435_v61 = vpop.f32.mrb[45].mxu0  ;;  %v2465_v63 = vpop.f32.mrb[13].mxu1 }
 0x208   :  { %v868_v1 = vmul.f32 %v2220_v54, %v772_v56  ;;  %v2436_v2 = vadd.f32 %v2435_v61, %v2434_v57  ;;  %v2437_v3 = vpop.f32.mrb[46].mxu0  ;;  %2872 = vmatprep.mubr.msk.f32.mxu0 %vm899_vm1, %v867_v55  ;;  %v3513_v4 = vadd.f32 %v2465_v63, %v2464_v59  ;;  %v2467_v5 = vpop.f32.mrb[14].mxu1  ;;  %v2340_v55 = vld [vmem:[%s4044_s8 + $0x20] sm:$0xff]  }
 0x209   :  { %v2438_v8 = vpop.f32.mrb[47].mxu0  ;;  %v2468_v6 = vpop.f32.mrb[15].mxu1  ;;  %v2228_v0 = vunpack.c.h.bf16 %v2340_v55 }
 0x20a   :  { %v665_v9 = vadd.f32 %v2436_v2, %v3476_v58  ;;  %v2439_v11 = vadd.f32 %v2438_v8, %v2437_v3  ;;  %2873 = vmatmul.mubr.msk.f32.gmra.mrb[56].mxu0 %vm899_vm1, %v868_v1  ;;  %v3517_v13 = vadd.f32 %v2468_v6, %v2467_v5  ;;  %v2341_v5 = vld [vmem:[%s4044_s8 + $0x28] sm:$0xff]   ;;  %v2227_v6 = vunpack.c.l.bf16 %v2340_v55 }
 0x20c   :  { %v773_v14 = vmax.f32 %v665_v9, 0.0  ;;  %v668_v15 = vadd.f32 %v2439_v11, %v3476_v58  ;;  %v684_v11 = vadd.f32 %v3484_v7, %v3476_v58  ;;  %v692_v7 = vadd.f32 %v3495_v60, %v3476_v58 }
 0x20e   :  { %v869_v17 = vmul.f32 %v2223_v10, %v773_v14  ;;  %v774_v18 = vmax.f32 %v668_v15, 0.0  ;;  %v2440_v51 = vpop.f32.mrb[48].mxu0  ;;  %v2470_v53 = vpop.f32.mrb[16].mxu1 }
 0x20f   :  { %v2441_v54 = vpop.f32.mrb[49].mxu0  ;;  %v2471_v56 = vpop.f32.mrb[17].mxu1 }
 0x210   :  { %v870_v57 = vmul.f32 %v2224_v16, %v774_v18  ;;  %v2442_v59 = vadd.f32 %v2441_v54, %v2440_v51  ;;  %v2443_v61 = vpop.f32.mrb[50].mxu0  ;;  %2875 = vmatprep.mubr.msk.f32.mxu0 %vm899_vm1, %v869_v17  ;;  %v2472_v63 = vadd.f32 %v2471_v56, %v2470_v53  ;;  %v2473_v1 = vpop.f32.mrb[18].mxu1  ;;  %v777_v16 = vmax.f32 %v681_v62, 0.0  ;;  %v2342_v51 = vld [vmem:[%s4044_s8 + $0x30] sm:$0xff]  }
 0x211   :  { %v2444_v2 = vpop.f32.mrb[51].mxu0  ;;  %v2474_v3 = vpop.f32.mrb[19].mxu1  ;;  %v2231_v17 = vunpack.c.l.bf16 %v2341_v5  ;;  %v689_v18 = vadd.f32 %v3491_v52, %v3476_v58 }
 0x212   :  { %v673_v8 = vadd.f32 %v2442_v59, %v3476_v58  ;;  %v2445_v9 = vadd.f32 %v2444_v2, %v2443_v61  ;;  %2876 = vmatmul.mubr.msk.f32.gmra.mrb[58].mxu0 %vm899_vm1, %v870_v57  ;;  %v2475_v10 = vadd.f32 %v2474_v3, %v2473_v1  ;;  %v2232_v57 = vunpack.c.h.bf16 %v2341_v5  ;;  %v2343_v5 = vld [vmem:[%s4044_s8 + $0x38] sm:$0xff]  }
 0x213   :  { %v778_v61 = vmax.f32 %v684_v11, 0.0  ;;  %v873_v2 = vmul.f32 %v2231_v17, %v777_v16  ;;  %v779_v52 = vmax.f32 %v689_v18, 0.0  ;;  %v2235_v3 = vunpack.c.l.bf16 %v2342_v51  ;;  %v2344_v18 = vld [vmem:[%s4044_s8 + $0x40] sm:$0xff]  }
 0x214   :  { %v775_v14 = vmax.f32 %v673_v8, 0.0  ;;  %v676_v15 = vadd.f32 %v2445_v9, %v3476_v58  ;;  %v697_v8 = vadd.f32 %v3502_v12, %v3476_v58  ;;  %v780_v11 = vmax.f32 %v692_v7, 0.0 }
 0x215   :  { %v874_v60 = vmul.f32 %v2232_v57, %v778_v61  ;;  %v2239_v17 = vunpack.c.l.bf16 %v2343_v5  ;;  %v705_v12 = vadd.f32 %v3513_v4, %v3476_v58 }
 0x216   :  { %v871_v53 = vmul.f32 %v2227_v6, %v775_v14  ;;  %v776_v54 = vmax.f32 %v676_v15, 0.0  ;;  %v2476_v56 = vpop.f32.mrb[20].mxu1  ;;  %v2236_v14 = vunpack.c.h.bf16 %v2342_v51  ;;  %v700_v15 = vadd.f32 %v3506_v50, %v3476_v58 }
 0x217   :  { %v2477_v59 = vpop.f32.mrb[21].mxu1  ;;  %v781_v16 = vmax.f32 %v697_v8, 0.0  ;;  %v708_v50 = vadd.f32 %v3517_v13, %v3476_v58  ;;  %v783_v4 = vmax.f32 %v705_v12, 0.0  ;;  %v2244_v13 = vunpack.c.h.bf16 %v2344_v18 }
 0x218   :  { %v872_v1 = vmul.f32 %v2228_v0, %v776_v54  ;;  %2878 = vmatprep.mubr.msk.f32.mxu0 %vm899_vm1, %v871_v53  ;;  %v2478_v55 = vadd.f32 %v2477_v59, %v2476_v56  ;;  %v2479_v62 = vpop.f32.mrb[22].mxu1  ;;  %v875_v0 = vmul.f32 %v2235_v3, %v779_v52  ;;  %v2240_v54 = vunpack.c.h.bf16 %v2343_v5  ;;  %v2345_v52 = vld [vmem:[%s4044_s8 + $0x48] sm:$0xff]  }
 0x219   :  { %v2480_v6 = vpop.f32.mrb[23].mxu1  ;;  %v876_v56 = vmul.f32 %v2236_v14, %v780_v11  ;;  %v782_v57 = vmax.f32 %v700_v15, 0.0  ;;  %v877_v7 = vmul.f32 %v2239_v17, %v781_v16  ;;  %v716_v5 = vadd.f32 %v2475_v10, %v3476_v58  ;;  %v2346_v15 = vld [vmem:[%s4044_s8 + $0x50] sm:$0xff]  }
 0x21a   :  { %2879 = vmatmul.mubr.msk.f32.gmra.mrb[60].mxu0 %vm899_vm1, %v872_v1  ;;  %v2481_v9 = vadd.f32 %v2480_v6, %v2479_v62  ;;  %v2243_v1 = vunpack.c.l.bf16 %v2344_v18  ;;  %v713_v62 = vadd.f32 %v2472_v63, %v3476_v58  ;;  %v784_v6 = vmax.f32 %v708_v50, 0.0 }
 0x21b   :  { %2881 = vmatprep.mubr.msk.f32.mxu0 %vm899_vm1, %v873_v2  ;;  %v878_v8 = vmul.f32 %v2240_v54, %v782_v57  ;;  %v2247_v14 = vunpack.c.l.bf16 %v2345_v52  ;;  %v721_v63 = vadd.f32 %v2478_v55, %v3476_v58  ;;  %v2248_v16 = vunpack.c.h.bf16 %v2345_v52 }
 0x21c   :  { %v785_v11 = vmax.f32 %v713_v62, 0.0  ;;  %v880_v12 = vmul.f32 %v2244_v13, %v784_v6  ;;  %v786_v18 = vmax.f32 %v716_v5, 0.0  ;;  %v724_v10 = vadd.f32 %v2481_v9, %v3476_v58  ;;  %v2348_v6 = vld [vmem:[%s4044_s8 + $0x60] sm:$0xff]  }
 0x21d   :  { %v2251_v55 = vunpack.c.l.bf16 %v2346_v15  ;;  %v2252_v9 = vunpack.c.h.bf16 %v2346_v15 }
 0x21e   :  { %2882 = vmatmul.mubr.msk.f32.gmra.mrb[62].mxu0 %vm899_vm1, %v874_v60  ;;  %v2482_v53 = vpop.f32.mrb[24].mxu1  ;;  %v879_v60 = vmul.f32 %v2243_v1, %v783_v4  ;;  %v882_v4 = vmul.f32 %v2248_v16, %v786_v18  ;;  %v788_v1 = vmax.f32 %v724_v10, 0.0  ;;  %v2349_v10 = vld [vmem:[%s4044_s8 + $0x68] sm:$0xff]  }
 0x21f   :  { %2884 = vmatprep.mubr.msk.f32.mxu0 %vm899_vm1, %v875_v0  ;;  %v2483_v51 = vpop.f32.mrb[25].mxu1 }
 0x220   :  { %v2484_v59 = vadd.f32 %v2483_v51, %v2482_v53  ;;  %v2485_v61 = vpop.f32.mrb[26].mxu1  ;;  %v881_v51 = vmul.f32 %v2247_v14, %v785_v11  ;;  %v884_v11 = vmul.f32 %v2252_v9, %v788_v1  ;;  %v2350_v1 = vld [vmem:[%s4044_s8 + $0x70] sm:$0xff]  }
 0x221   :  { %v2486_v2 = vpop.f32.mrb[27].mxu1 }
 0x222   :  { %2885 = vmatmul.mubr.msk.f32.gmra.mrb[64].mxu0 %vm899_vm1, %v876_v56  ;;  %v2487_v3 = vadd.f32 %v2486_v2, %v2485_v61  ;;  %v787_v56 = vmax.f32 %v721_v63, 0.0  ;;  %v729_v57 = vadd.f32 %v2484_v59, %v3476_v58  ;;  %v2347_v61 = vld [vmem:[%s4044_s8 + $0x58] sm:$0xff]  }
 0x223   :  { %2887 = vmatprep.mubr.msk.f32.mxu0 %vm899_vm1, %v877_v7  ;;  %v2256_v5 = vunpack.c.h.bf16 %v2347_v61 }
 0x224   :  { %v732_v62 = vadd.f32 %v2487_v3, %v3476_v58  ;;  %v883_v2 = vmul.f32 %v2251_v55, %v787_v56  ;;  %v789_v52 = vmax.f32 %v729_v57, 0.0  ;;  %v2260_v56 = vunpack.c.h.bf16 %v2348_v6 }
 0x226   :  { %2888 = vmatmul.mubr.msk.f32.gmra.mrb[66].mxu0 %vm899_vm1, %v878_v8  ;;  %v2488_v0 = vpop.f32.mrb[28].mxu1  ;;  %v2255_v8 = vunpack.c.l.bf16 %v2347_v61  ;;  %v790_v14 = vmax.f32 %v732_v62, 0.0  ;;  %v2263_v61 = vunpack.c.l.bf16 %v2349_v10 }
 0x227   :  { %2890 = vmatprep.mubr.msk.f32.mxu0 %vm899_vm1, %v879_v60  ;;  %v2489_v17 = vpop.f32.mrb[29].mxu1 }
 0x228   :  { %v2490_v53 = vadd.f32 %v2489_v17, %v2488_v0  ;;  %v2491_v54 = vpop.f32.mrb[30].mxu1  ;;  %v885_v0 = vmul.f32 %v2255_v8, %v789_v52  ;;  %v2259_v17 = vunpack.c.l.bf16 %v2348_v6 }
 0x229   :  { %v2492_v50 = vpop.f32.mrb[31].mxu1 }
 0x22a   :  { %2891 = vmatmul.mubr.msk.f32.gmra.mrb[68].mxu0 %vm899_vm1, %v880_v12  ;;  %v2493_v7 = vadd.f32 %v2492_v50, %v2491_v54  ;;  %v737_v59 = vadd.f32 %v2490_v53, %v3476_v58  ;;  %v886_v54 = vmul.f32 %v2256_v5, %v790_v14  ;;  %v2267_v5 = vunpack.c.l.bf16 %v2350_v1 }
 0x22b   :  { %2893 = vmatprep.mubr.msk.f32.mxu0 %vm899_vm1, %v881_v51 }
 0x22c   :  { %v740_v3 = vadd.f32 %v2493_v7, %v3476_v58  ;;  %v791_v16 = vmax.f32 %v737_v59, 0.0 }
 0x22e   :  { %2894 = vmatmul.mubr.msk.f32.gmra.mrb[70].mxu0 %vm899_vm1, %v882_v4  ;;  %v2494_v13 = vpop.f32.mrb[32].mxu1  ;;  %v792_v51 = vmax.f32 %v740_v3, 0.0  ;;  %v887_v57 = vmul.f32 %v2259_v17, %v791_v16 }
 0x22f   :  { %2896 = vmatprep.mubr.msk.f32.mxu0 %vm899_vm1, %v883_v2  ;;  %v2495_v60 = vpop.f32.mrb[33].mxu1  ;;  %v2264_v2 = vunpack.c.h.bf16 %v2349_v10 }
 0x230   :  { %v2496_v63 = vadd.f32 %v2495_v60, %v2494_v13  ;;  %v2497_v15 = vpop.f32.mrb[34].mxu1  ;;  %v888_v9 = vmul.f32 %v2260_v56, %v792_v51 }
 0x231   :  { %v2498_v12 = vpop.f32.mrb[35].mxu1 }
 0x232   :  { %2897 = vmatmul.mubr.msk.f32.gmra.mrb[72].mxu0 %vm899_vm1, %v884_v11  ;;  %v745_v18 = vadd.f32 %v2496_v63, %v3476_v58  ;;  %v2499_v53 = vadd.f32 %v2498_v12, %v2497_v15  ;;  %v2268_v63 = vunpack.c.h.bf16 %v2350_v1  ;;  %v2351_v12 = vld [vmem:[%s4044_s8 + $0x78] sm:$0xff]  }
 0x233   :  { %2899 = vmatprep.mubr.msk.f32.mxu0 %vm899_vm1, %v885_v0  ;;  %v2271_v56 = vunpack.c.l.bf16 %v2351_v12 }
 0x234   :  { %v748_v55 = vadd.f32 %v2499_v53, %v3476_v58  ;;  %v793_v50 = vmax.f32 %v745_v18, 0.0 }
 0x236   :  { %v2500_v7 = vpop.f32.mrb[36].mxu1  ;;  %2900 = vmatmul.mubr.msk.f32.gmra.mrb[74].mxu0 %vm899_vm1, %v886_v54  ;;  %v794_v62 = vmax.f32 %v748_v55, 0.0  ;;  %v889_v59 = vmul.f32 %v2263_v61, %v793_v50  ;;  %v2272_v61 = vunpack.c.h.bf16 %v2351_v12 }
 0x237   :  { %v2501_v4 = vpop.f32.mrb[37].mxu1  ;;  %2902 = vmatprep.mubr.msk.f32.mxu0 %vm899_vm1, %v887_v57 }
 0x238   :  { %v2502_v52 = vadd.f32 %v2501_v4, %v2500_v7  ;;  %v2503_v8 = vpop.f32.mrb[38].mxu1  ;;  %v890_v11 = vmul.f32 %v2264_v2, %v794_v62 }
 0x239   :  { %v2504_v6 = vpop.f32.mrb[39].mxu1 }
 0x23a   :  { %v753_v13 = vadd.f32 %v2502_v52, %v3476_v58  ;;  %v2505_v60 = vadd.f32 %v2504_v6, %v2503_v8  ;;  %2903 = vmatmul.mubr.msk.f32.gmra.mrb[76].mxu0 %vm899_vm1, %v888_v9 }
 0x23b   :  { %2905 = vmatprep.mubr.msk.f32.mxu0 %vm899_vm1, %v889_v59 }
 0x23c   :  { %v795_v14 = vmax.f32 %v753_v13, 0.0  ;;  %v756_v3 = vadd.f32 %v2505_v60, %v3476_v58 }
 0x23e   :  { %v891_v15 = vmul.f32 %v2267_v5, %v795_v14  ;;  %v796_v0 = vmax.f32 %v756_v3, 0.0  ;;  %v2506_v16 = vpop.f32.mrb[40].mxu1  ;;  %2906 = vmatmul.mubr.msk.f32.gmra.mrb[78].mxu0 %vm899_vm1, %v890_v11 }
 0x23f   :  { %v2507_v17 = vpop.f32.mrb[41].mxu1 }
 0x240   :  { %v892_v18 = vmul.f32 %v2268_v63, %v796_v0  ;;  %v2508_v10 = vadd.f32 %v2507_v17, %v2506_v16  ;;  %v2509_v53 = vpop.f32.mrb[42].mxu1  ;;  %2908 = vmatprep.mubr.msk.f32.mxu0 %vm899_vm1, %v891_v15 }
 0x241   :  { %v2510_v54 = vpop.f32.mrb[43].mxu1 }
 0x242   :  { %v761_v51 = vadd.f32 %v2508_v10, %v3476_v58  ;;  %v2511_v55 = vadd.f32 %v2510_v54, %v2509_v53  ;;  %2909 = vmatmul.mubr.msk.f32.gmra.mrb[80].mxu0 %vm899_vm1, %v892_v18 }
 0x244   :  { %v797_v57 = vmax.f32 %v761_v51, 0.0  ;;  %v764_v50 = vadd.f32 %v2511_v55, %v3476_v58 }
 0x246   :  { %v893_v7 = vmul.f32 %v2271_v56, %v797_v57  ;;  %v798_v4 = vmax.f32 %v764_v50, 0.0 }
 0x248   :  { %v894_v1 = vmul.f32 %v2272_v61, %v798_v4  ;;  %2911 = vmatprep.mubr.msk.f32.mxu0 %vm899_vm1, %v893_v7 }
 0x24a   :  { %2912 = vmatmul.mubr.msk.f32.gmra.mrb[82].mxu0 %vm899_vm1, %v894_v1 }
 0x24b   :  { %1276 = vmatprep.mubr.bf16.mxu0 %v3275_v33 }
 0x2cd   :  { %v2868_v9 = vpop.f32.mrb[52].mxu0 }
 0x2ce   :  { %v1062_v62 = vpop.f32.mrb[53].mxu0 }
 0x2cf   :  { %v1221_v2 = vpack.c.bf16 %v2868_v9, %v1062_v62 }
 0x2d5   :  { %v2871_v52 = vpop.f32.mrb[54].mxu0 }
 0x2d6   :  { %v1072_v8 = vpop.f32.mrb[55].mxu0 }
 0x2d7   :  { %v1222_v59 = vpack.c.bf16 %v2871_v52, %v1072_v8 }
 0x2dd   :  { %v2874_v6 = vpop.f32.mrb[56].mxu0 }
 0x2de   :  { %v1082_v13 = vpop.f32.mrb[57].mxu0 }
 0x2df   :  { %v1223_v5 = vpack.c.bf16 %v2874_v6, %v1082_v13 }
 0x2e5   :  { %v2877_v58 = vpop.f32.mrb[58].mxu0 }
 0x2e6   :  { %v1092_v60 = vpop.f32.mrb[59].mxu0 }
 0x2e7   :  { %v1224_v11 = vpack.c.bf16 %v2877_v58, %v1092_v60 }
 0x2ed   :  { %v2880_v14 = vpop.f32.mrb[60].mxu0 }
 0x2ee   :  { %v1102_v3 = vpop.f32.mrb[61].mxu0 }
 0x2ef   :  { %v1225_v63 = vpack.c.bf16 %v2880_v14, %v1102_v3 }
 0x2f1   :  { %v2883_v15 = vpop.f32.mrb[62].mxu0 }
 0x2f2   :  { %v1112_v0 = vpop.f32.mrb[63].mxu0 }
 0x2f3   :  { %v1226_v16 = vpack.c.bf16 %v2883_v15, %v1112_v0  ;;  %v1533_v15 = vld [vmem:[%s4045_s6] sm:$0xff] }
 0x2f5   :  { %v2886_v17 = vpop.f32.mrb[64].mxu0 }
 0x2f6   :  { %v1122_v33 = vpop.f32.mrb[65].mxu0 }
 0x2f7   :  { %v1227_v12 = vpack.c.bf16 %v2886_v17, %v1122_v33 }
 0x2f9   :  { %v2889_v18 = vpop.f32.mrb[66].mxu0 }
 0x2fa   :  { %v1132_v10 = vpop.f32.mrb[67].mxu0 }
 0x2fb   :  { %v1228_v53 = vpack.c.bf16 %v2889_v18, %v1132_v10 }
 0x2fd   :  { %v2892_v54 = vpop.f32.mrb[68].mxu0 }
 0x2fe   :  { %v1142_v51 = vpop.f32.mrb[69].mxu0 }
 0x2ff   :  { %v1229_v56 = vpack.c.bf16 %v2892_v54, %v1142_v51 }
 0x301   :  { %v2895_v55 = vpop.f32.mrb[70].mxu0  ;;  %2548 = vmatprep.subr.bf16.mxu0 %v1229_v56 }
 0x302   :  { %v1152_v57 = vpop.f32.mrb[71].mxu0  ;;  %2549 = vmatpush3.bf16.msra.mxu0 %v1221_v2 }
 0x303   :  { %v1230_v50 = vpack.c.bf16 %v2895_v55, %v1152_v57 }
 0x305   :  { %v2898_v61 = vpop.f32.mrb[72].mxu0  ;;  %2550 = vmatprep.subr.bf16.mxu0 %v1230_v50 }
 0x306   :  { %v1162_v7 = vpop.f32.mrb[73].mxu0  ;;  %2551 = vmatpush3.bf16.msra.mxu0 %v1222_v59 }
 0x307   :  { %v1231_v4 = vpack.c.bf16 %v2898_v61, %v1162_v7 }
 0x309   :  { %v2901_v1 = vpop.f32.mrb[74].mxu0  ;;  %2552 = vmatprep.subr.bf16.mxu0 %v1231_v4 }
 0x30a   :  { %v1172_v9 = vpop.f32.mrb[75].mxu0  ;;  %2553 = vmatpush3.bf16.msra.mxu0 %v1223_v5 }
 0x30b   :  { %v1232_v62 = vpack.c.bf16 %v2901_v1, %v1172_v9 }
 0x30d   :  { %v2904_v52 = vpop.f32.mrb[76].mxu0  ;;  %2554 = vmatprep.subr.bf16.mxu0 %v1232_v62 }
 0x30e   :  { %v1182_v8 = vpop.f32.mrb[77].mxu0  ;;  %2555 = vmatpush3.bf16.msra.mxu0 %v1224_v11  ;;  %v1534_v11 = vld [vmem:[%s4045_s6 + $0x8] sm:$0xff] }
 0x30f   :  { %v1233_v6 = vpack.c.bf16 %v2904_v52, %v1182_v8 }
 0x311   :  { %v2907_v13 = vpop.f32.mrb[78].mxu0  ;;  %2556 = vmatprep.subr.bf16.mxu0 %v1233_v6  ;;  %v2354_v6 = vld [vmem:[%s4047_s9 + $0x18] sm:$0xff]  }
 0x312   :  { %v1192_v58 = vpop.f32.mrb[79].mxu0  ;;  %2557 = vmatpush3.bf16.msra.mxu0 %v1225_v63  ;;  %v2978_v63 = vpack.c.bf16 %v1534_v11, %v1533_v15  ;;  %v2288_v11 = vunpack.c.h.bf16 %v2354_v6 }
 0x313   :  { %v1234_v2 = vpack.c.bf16 %v2907_v13, %v1192_v58 }
 0x314   :  { %3002 = vmatprep.subr.bf16.mxu1 %v2978_v63 }
 0x315   :  { %v2910_v60 = vpop.f32.mrb[80].mxu0  ;;  %2558 = vmatprep.subr.bf16.mxu0 %v1234_v2  ;;  %3004 = vmatpush3.bf16.msra.mxu1 %v2978_v63 }
 0x316   :  { %v1202_v14 = vpop.f32.mrb[81].mxu0  ;;  %2559 = vmatpush3.bf16.msra.mxu0 %v1226_v16 }
 0x317   :  { %v1235_v59 = vpack.c.bf16 %v2910_v60, %v1202_v14 }
 0x319   :  { %2560 = vmatprep.subr.bf16.mxu0 %v1235_v59  ;;  %v2287_v59 = vunpack.c.l.bf16 %v2354_v6 }
 0x31a   :  { %2561 = vmatpush3.bf16.msra.mxu0 %v1227_v12 }
 0x31d   :  { %v2913_v3 = vpop.f32.mrb[82].mxu0 }
 0x31e   :  { %v1212_v5 = vpop.f32.mrb[83].mxu0 }
 0x31f   :  { %v1236_v0 = vpack.c.bf16 %v2913_v3, %v1212_v5 }
 0x321   :  { %2562 = vmatprep.subr.bf16.mxu0 %v1236_v0 }
 0x322   :  { %2563 = vmatpush3.bf16.msra.mxu0 %v1228_v53  ;;  %v2353_v53 = vld [vmem:[%s4047_s9 + $0x10] sm:$0xff]  }
 0x323   :  { %2979 = vmatprep.subr.bf16.mxu0 %v2978_v63  ;;  %v2283_v50 = vunpack.c.l.bf16 %v2353_v53  ;;  %v2284_v1 = vunpack.c.h.bf16 %v2353_v53 }
 0x325   :  { %1277 = vmatmul.mubr.bf16.vlgmr.msra.gmra.mrb[84].mxu0 %v3284_v19  ;;  %v3633_v19 = vld [vmem:[%s4041_s0 + $0x54] ss:$8 sps:$4 sm:$0xff]  }
 0x326   :  { %1284 = vmatprep.mubr.bf16.mxu0 %v3294_v21  ;;  %2981 = vmatpush3.bf16.msra.mxu0 %v2978_v63  ;;  %v1536_v21 = vld [vmem:[%s4045_s6 + $0x18] sm:$0xff] }
 0x32d   :  { %1285 = vmatmul.mubr.bf16.gmra.mrb[88].mxu0 %v3308_v23 }
 0x32e   :  { %1292 = vmatprep.mubr.bf16.mxu0 %v3318_v25 }
 0x335   :  { %1293 = vmatmul.mubr.bf16.gmra.mrb[92].mxu0 %v3332_v27 }
 0x336   :  { %1300 = vmatprep.mubr.bf16.mxu0 %v3342_v29 }
 0x33d   :  { %1301 = vmatmul.mubr.bf16.gmra.mrb[96].mxu0 %v3356_v31 }
 0x33e   :  { %1308 = vmatprep.mubr.bf16.mxu0 %v3366_v34 }
 0x345   :  { %1309 = vmatmul.mubr.bf16.gmra.mrb[100].mxu0 %v3380_v36 }
 0x346   :  { %1316 = vmatprep.mubr.bf16.mxu0 %v3633_v19 }
 0x34d   :  { %1317 = vmatmul.mubr.bf16.gmra.mrb[104].mxu0 %v3289_v20  ;;  %v1535_v20 = vld [vmem:[%s4045_s6 + $0x10] sm:$0xff] }
 0x34e   :  { %1324 = vmatprep.mubr.bf16.mxu0 %v3299_v22  ;;  %v2982_v22 = vpack.c.bf16 %v1536_v21, %v1535_v20 }
 0x350   :  { %2983 = vmatprep.subr.bf16.mxu0 %v2982_v22  ;;  %3003 = vmatprep.subr.bf16.mxu1 %v2982_v22 }
 0x351   :  { %2985 = vmatpush3.bf16.msra.mxu0 %v2982_v22  ;;  %3005 = vmatpush3.bf16.msra.mxu1 %v2982_v22  ;;  %v2355_v22 = vld [vmem:[%s4047_s9 + $0x20] sm:$0xff]  }
 0x355   :  { %1325 = vmatmul.mubr.bf16.gmra.mrb[108].mxu0 %v3313_v24  ;;  %v3666_v24 = vld [vmem:[%s4046_s5] ss:$0 sm:$0xff] }
 0x356   :  { %1332 = vmatprep.mubr.bf16.mxu0 %v3323_v26  ;;  %v2274_v26 = vld [vmem:[%s4047_s9] sm:$0xff]  }
 0x357   :  { %v2275_v31 = vunpack.c.l.bf16 %v2274_v26  ;;  %v2276_v36 = vunpack.c.h.bf16 %v2274_v26 }
 0x35d   :  { %1333 = vmatmul.mubr.bf16.gmra.mrb[112].mxu0 %v3337_v28 }
 0x35e   :  { %1340 = vmatprep.mubr.bf16.mxu0 %v3347_v30 }
 0x365   :  { %1341 = vmatmul.mubr.bf16.gmra.mrb[116].mxu0 %v3361_v32 }
 0x366   :  { %1348 = vmatprep.mubr.bf16.mxu0 %v3371_v35 }
 0x36d   :  { %1349 = vmatmul.mubr.bf16.gmra.mrb[120].mxu0 %v3385_v37 }
 0x36e   :  { %1356 = vmatprep.mubr.bf16.mxu0 %v3390_v38 }
 0x375   :  { %1357 = vmatmul.mubr.bf16.gmra.mrb[124].mxu0 %v3398_v39 }
 0x376   :  { %1364 = vmatprep.mubr.bf16.mxu0 %v3403_v40 }
 0x37d   :  { %1365 = vmatmul.mubr.bf16.gmra.mrb[128].mxu0 %v3410_v41  ;;  %v2352_v41 = vld [vmem:[%s4047_s9 + $0x8] sm:$0xff]  }
 0x37e   :  { %1372 = vmatprep.mubr.bf16.mxu0 %v3415_v42  ;;  %v2280_v17 = vunpack.c.h.bf16 %v2352_v41 }
 0x385   :  { %1373 = vmatmul.mubr.bf16.gmra.mrb[132].mxu0 %v3422_v43 }
 0x386   :  { %1380 = vmatprep.mubr.bf16.mxu0 %v3427_v44 }
 0x38d   :  { %1381 = vmatmul.mubr.bf16.gmra.mrb[136].mxu0 %v3434_v45 }
 0x38e   :  { %1388 = vmatprep.mubr.bf16.mxu0 %v3439_v46 }
 0x395   :  { %1389 = vmatmul.mubr.bf16.gmra.mrb[140].mxu0 %v3446_v47  ;;  %v2279_v47 = vunpack.c.l.bf16 %v2352_v41 }
 0x396   :  { %1396 = vmatprep.mubr.bf16.mxu0 %v3451_v48 }
 0x39d   :  { %1397 = vmatmul.mubr.bf16.gmra.mrb[144].mxu0 %v3458_v49 }
 0x3f8   :  { %v2564_v23 = vpop.f32.mrb[84].mxu0 }
 0x3f9   :  { %v2565_v25 = vpop.f32.mrb[85].mxu0 }
 0x3fa   :  { %v2566_v27 = vadd.f32 %v2565_v25, %v2564_v23  ;;  %v2567_v28 = vpop.f32.mrb[86].mxu0 }
 0x3fb   :  { %v2568_v29 = vpop.f32.mrb[87].mxu0 }
 0x3fc   :  { %v1279_v30 = vadd.f32 %v2566_v27, %v3666_v24  ;;  %v2569_v32 = vadd.f32 %v2568_v29, %v2567_v28  ;;  %v2291_v29 = vunpack.c.l.bf16 %v2355_v22 }
 0x3fe   :  { %v1405_v34 = vmax.f32 %v1279_v30, 0.0  ;;  %v1282_v35 = vadd.f32 %v2569_v32, %v3666_v24 }
 0x400   :  { %v1501_v37 = vmul.f32 %v2275_v31, %v1405_v34  ;;  %v1406_v38 = vmax.f32 %v1282_v35, 0.0  ;;  %v2570_v39 = vpop.f32.mrb[88].mxu0  ;;  %v2292_v34 = vunpack.c.h.bf16 %v2355_v22 }
 0x401   :  { %v2571_v40 = vpop.f32.mrb[89].mxu0 }
 0x402   :  { %v1502_v42 = vmul.f32 %v2276_v36, %v1406_v38  ;;  %v2572_v43 = vadd.f32 %v2571_v40, %v2570_v39  ;;  %v2573_v44 = vpop.f32.mrb[90].mxu0  ;;  %2922 = vmatprep.mubr.msk.f32.mxu0 %vm899_vm1, %v1501_v37  ;;  %v2356_v39 = vld [vmem:[%s4047_s9 + $0x28] sm:$0xff]  }
 0x403   :  { %v2574_v45 = vpop.f32.mrb[91].mxu0 }
 0x404   :  { %v1287_v46 = vadd.f32 %v2572_v43, %v3666_v24  ;;  %v2575_v48 = vadd.f32 %v2574_v45, %v2573_v44  ;;  %2923 = vmatmul.mubr.msk.f32.vlgmr.msra.gmra.mrb[148].mxu0 %vm899_vm1, %v1502_v42  ;;  %v2295_v45 = vunpack.c.l.bf16 %v2356_v39 }
 0x406   :  { %v1407_v49 = vmax.f32 %v1287_v46, 0.0  ;;  %v1290_v16 = vadd.f32 %v2575_v48, %v3666_v24 }
 0x408   :  { %v1503_v33 = vmul.f32 %v2279_v47, %v1407_v49  ;;  %v1408_v12 = vmax.f32 %v1290_v16, 0.0  ;;  %v2576_v18 = vpop.f32.mrb[92].mxu0  ;;  %v2296_v49 = vunpack.c.h.bf16 %v2356_v39 }
 0x409   :  { %v2577_v10 = vpop.f32.mrb[93].mxu0 }
 0x40a   :  { %v1504_v54 = vmul.f32 %v2280_v17, %v1408_v12  ;;  %v2578_v51 = vadd.f32 %v2577_v10, %v2576_v18  ;;  %v2579_v56 = vpop.f32.mrb[94].mxu0  ;;  %2925 = vmatprep.mubr.msk.f32.mxu1 %vm899_vm1, %v1503_v33  ;;  %v2357_v18 = vld [vmem:[%s4047_s9 + $0x30] sm:$0xff]  }
 0x40b   :  { %v2580_v55 = vpop.f32.mrb[95].mxu0 }
 0x40c   :  { %v1295_v57 = vadd.f32 %v2578_v51, %v3666_v24  ;;  %v2581_v61 = vadd.f32 %v2580_v55, %v2579_v56  ;;  %2926 = vmatmul.mubr.msk.f32.vlgmr.msra.gmra.mrb[44].mxu1 %vm899_vm1, %v1504_v54  ;;  %v2299_v55 = vunpack.c.l.bf16 %v2357_v18 }
 0x40e   :  { %v1409_v7 = vmax.f32 %v1295_v57, 0.0  ;;  %v1298_v4 = vadd.f32 %v2581_v61, %v3666_v24 }
 0x410   :  { %v1505_v9 = vmul.f32 %v2283_v50, %v1409_v7  ;;  %v1410_v62 = vmax.f32 %v1298_v4, 0.0  ;;  %v2582_v52 = vpop.f32.mrb[96].mxu0  ;;  %v2300_v7 = vunpack.c.h.bf16 %v2357_v18 }
 0x411   :  { %v2583_v8 = vpop.f32.mrb[97].mxu0 }
 0x412   :  { %v1506_v13 = vmul.f32 %v2284_v1, %v1410_v62  ;;  %v2584_v58 = vadd.f32 %v2583_v8, %v2582_v52  ;;  %v2585_v2 = vpop.f32.mrb[98].mxu0  ;;  %2928 = vmatprep.mubr.msk.f32.mxu1 %vm899_vm1, %v1505_v9  ;;  %v2358_v52 = vld [vmem:[%s4047_s9 + $0x38] sm:$0xff]  }
 0x413   :  { %v2586_v60 = vpop.f32.mrb[99].mxu0 }
 0x414   :  { %v1303_v14 = vadd.f32 %v2584_v58, %v3666_v24  ;;  %v2587_v3 = vadd.f32 %v2586_v60, %v2585_v2  ;;  %2929 = vmatmul.mubr.msk.f32.gmra.mrb[46].mxu1 %vm899_vm1, %v1506_v13  ;;  %v2303_v60 = vunpack.c.l.bf16 %v2358_v52 }
 0x416   :  { %v1411_v5 = vmax.f32 %v1303_v14, 0.0  ;;  %v1306_v15 = vadd.f32 %v2587_v3, %v3666_v24 }
 0x418   :  { %v1507_v0 = vmul.f32 %v2287_v59, %v1411_v5  ;;  %v1412_v63 = vmax.f32 %v1306_v15, 0.0  ;;  %v2588_v20 = vpop.f32.mrb[100].mxu0  ;;  %v2304_v5 = vunpack.c.h.bf16 %v2358_v52 }
 0x419   :  { %v2589_v21 = vpop.f32.mrb[101].mxu0 }
 0x41a   :  { %v1508_v23 = vmul.f32 %v2288_v11, %v1412_v63  ;;  %v2590_v25 = vadd.f32 %v2589_v21, %v2588_v20  ;;  %v2591_v26 = vpop.f32.mrb[102].mxu0  ;;  %2931 = vmatprep.mubr.msk.f32.mxu1 %vm899_vm1, %v1507_v0  ;;  %v2359_v20 = vld [vmem:[%s4047_s9 + $0x40] sm:$0xff]  }
 0x41b   :  { %v2592_v27 = vpop.f32.mrb[103].mxu0 }
 0x41c   :  { %v1311_v28 = vadd.f32 %v2590_v25, %v3666_v24  ;;  %v2593_v30 = vadd.f32 %v2592_v27, %v2591_v26  ;;  %2932 = vmatmul.mubr.msk.f32.gmra.mrb[48].mxu1 %vm899_vm1, %v1508_v23  ;;  %v2307_v27 = vunpack.c.l.bf16 %v2359_v20 }
 0x41e   :  { %v1413_v31 = vmax.f32 %v1311_v28, 0.0  ;;  %v1314_v32 = vadd.f32 %v2593_v30, %v3666_v24 }
 0x420   :  { %v1509_v35 = vmul.f32 %v2291_v29, %v1413_v31  ;;  %v1414_v36 = vmax.f32 %v1314_v32, 0.0  ;;  %v2594_v37 = vpop.f32.mrb[104].mxu0  ;;  %v2308_v31 = vunpack.c.h.bf16 %v2359_v20 }
 0x421   :  { %v2595_v38 = vpop.f32.mrb[105].mxu0 }
 0x422   :  { %v1510_v40 = vmul.f32 %v2292_v34, %v1414_v36  ;;  %v2596_v41 = vadd.f32 %v2595_v38, %v2594_v37  ;;  %v2597_v42 = vpop.f32.mrb[106].mxu0  ;;  %2934 = vmatprep.mubr.msk.f32.mxu1 %vm899_vm1, %v1509_v35  ;;  %v2360_v37 = vld [vmem:[%s4047_s9 + $0x48] sm:$0xff]  }
 0x423   :  { %v2598_v43 = vpop.f32.mrb[107].mxu0 }
 0x424   :  { %v1319_v44 = vadd.f32 %v2596_v41, %v3666_v24  ;;  %v2599_v46 = vadd.f32 %v2598_v43, %v2597_v42  ;;  %2935 = vmatmul.mubr.msk.f32.gmra.mrb[50].mxu1 %vm899_vm1, %v1510_v40  ;;  %v2311_v43 = vunpack.c.l.bf16 %v2360_v37 }
 0x426   :  { %v1415_v47 = vmax.f32 %v1319_v44, 0.0  ;;  %v1322_v48 = vadd.f32 %v2599_v46, %v3666_v24 }
 0x428   :  { %v1511_v16 = vmul.f32 %v2295_v45, %v1415_v47  ;;  %v1416_v17 = vmax.f32 %v1322_v48, 0.0  ;;  %v2600_v33 = vpop.f32.mrb[108].mxu0  ;;  %v2312_v47 = vunpack.c.h.bf16 %v2360_v37 }
 0x429   :  { %v2601_v12 = vpop.f32.mrb[109].mxu0 }
 0x42a   :  { %v1512_v10 = vmul.f32 %v2296_v49, %v1416_v17  ;;  %v2602_v53 = vadd.f32 %v2601_v12, %v2600_v33  ;;  %v2603_v54 = vpop.f32.mrb[110].mxu0  ;;  %2937 = vmatprep.mubr.msk.f32.mxu1 %vm899_vm1, %v1511_v16  ;;  %v2361_v33 = vld [vmem:[%s4047_s9 + $0x50] sm:$0xff]  }
 0x42b   :  { %v2604_v51 = vpop.f32.mrb[111].mxu0 }
 0x42c   :  { %v1327_v56 = vadd.f32 %v2602_v53, %v3666_v24  ;;  %v2605_v57 = vadd.f32 %v2604_v51, %v2603_v54  ;;  %2938 = vmatmul.mubr.msk.f32.gmra.mrb[52].mxu1 %vm899_vm1, %v1512_v10  ;;  %v2315_v51 = vunpack.c.l.bf16 %v2361_v33 }
 0x42e   :  { %v1417_v50 = vmax.f32 %v1327_v56, 0.0  ;;  %v1330_v61 = vadd.f32 %v2605_v57, %v3666_v24 }
 0x430   :  { %v1513_v4 = vmul.f32 %v2299_v55, %v1417_v50  ;;  %v1418_v1 = vmax.f32 %v1330_v61, 0.0  ;;  %v2606_v9 = vpop.f32.mrb[112].mxu0  ;;  %v2316_v50 = vunpack.c.h.bf16 %v2361_v33 }
 0x431   :  { %v2607_v62 = vpop.f32.mrb[113].mxu0 }
 0x432   :  { %v1514_v8 = vmul.f32 %v2300_v7, %v1418_v1  ;;  %v2608_v6 = vadd.f32 %v2607_v62, %v2606_v9  ;;  %v2609_v13 = vpop.f32.mrb[114].mxu0  ;;  %2940 = vmatprep.mubr.msk.f32.mxu1 %vm899_vm1, %v1513_v4  ;;  %v2362_v9 = vld [vmem:[%s4047_s9 + $0x58] sm:$0xff]  }
 0x433   :  { %v2610_v58 = vpop.f32.mrb[115].mxu0 }
 0x434   :  { %v1335_v2 = vadd.f32 %v2608_v6, %v3666_v24  ;;  %v2611_v14 = vadd.f32 %v2610_v58, %v2609_v13  ;;  %2941 = vmatmul.mubr.msk.f32.gmra.mrb[54].mxu1 %vm899_vm1, %v1514_v8  ;;  %v2319_v58 = vunpack.c.l.bf16 %v2362_v9 }
 0x436   :  { %v1419_v59 = vmax.f32 %v1335_v2, 0.0  ;;  %v1338_v3 = vadd.f32 %v2611_v14, %v3666_v24 }
 0x438   :  { %v1515_v15 = vmul.f32 %v2303_v60, %v1419_v59  ;;  %v1420_v11 = vmax.f32 %v1338_v3, 0.0  ;;  %v2612_v0 = vpop.f32.mrb[116].mxu0  ;;  %v2320_v59 = vunpack.c.h.bf16 %v2362_v9 }
 0x439   :  { %v2613_v63 = vpop.f32.mrb[117].mxu0 }
 0x43a   :  { %v1516_v21 = vmul.f32 %v2304_v5, %v1420_v11  ;;  %v2614_v22 = vadd.f32 %v2613_v63, %v2612_v0  ;;  %v2615_v23 = vpop.f32.mrb[118].mxu0  ;;  %2943 = vmatprep.mubr.msk.f32.mxu1 %vm899_vm1, %v1515_v15  ;;  %v2363_v0 = vld [vmem:[%s4047_s9 + $0x60] sm:$0xff]  }
 0x43b   :  { %v2616_v25 = vpop.f32.mrb[119].mxu0 }
 0x43c   :  { %v1343_v26 = vadd.f32 %v2614_v22, %v3666_v24  ;;  %v2617_v28 = vadd.f32 %v2616_v25, %v2615_v23  ;;  %2944 = vmatmul.mubr.msk.f32.gmra.mrb[56].mxu1 %vm899_vm1, %v1516_v21  ;;  %v2323_v25 = vunpack.c.l.bf16 %v2363_v0 }
 0x43e   :  { %v1421_v29 = vmax.f32 %v1343_v26, 0.0  ;;  %v1346_v30 = vadd.f32 %v2617_v28, %v3666_v24 }
 0x440   :  { %v1517_v32 = vmul.f32 %v2307_v27, %v1421_v29  ;;  %v1422_v34 = vmax.f32 %v1346_v30, 0.0  ;;  %v2618_v35 = vpop.f32.mrb[120].mxu0  ;;  %v2324_v29 = vunpack.c.h.bf16 %v2363_v0 }
 0x441   :  { %v2619_v36 = vpop.f32.mrb[121].mxu0 }
 0x442   :  { %v1518_v38 = vmul.f32 %v2308_v31, %v1422_v34  ;;  %v2620_v39 = vadd.f32 %v2619_v36, %v2618_v35  ;;  %v2621_v40 = vpop.f32.mrb[122].mxu0  ;;  %2946 = vmatprep.mubr.msk.f32.mxu1 %vm899_vm1, %v1517_v32  ;;  %v2364_v35 = vld [vmem:[%s4047_s9 + $0x68] sm:$0xff]  }
 0x443   :  { %v2622_v41 = vpop.f32.mrb[123].mxu0 }
 0x444   :  { %v1351_v42 = vadd.f32 %v2620_v39, %v3666_v24  ;;  %v2623_v44 = vadd.f32 %v2622_v41, %v2621_v40  ;;  %2947 = vmatmul.mubr.msk.f32.gmra.mrb[58].mxu1 %vm899_vm1, %v1518_v38  ;;  %v2327_v41 = vunpack.c.l.bf16 %v2364_v35 }
 0x446   :  { %v1423_v45 = vmax.f32 %v1351_v42, 0.0  ;;  %v1354_v46 = vadd.f32 %v2623_v44, %v3666_v24 }
 0x448   :  { %v1519_v48 = vmul.f32 %v2311_v43, %v1423_v45  ;;  %v1424_v49 = vmax.f32 %v1354_v46, 0.0  ;;  %v2624_v16 = vpop.f32.mrb[124].mxu0  ;;  %v2328_v45 = vunpack.c.h.bf16 %v2364_v35 }
 0x449   :  { %v2625_v17 = vpop.f32.mrb[125].mxu0 }
 0x44a   :  { %v1520_v12 = vmul.f32 %v2312_v47, %v1424_v49  ;;  %v2626_v18 = vadd.f32 %v2625_v17, %v2624_v16  ;;  %v2627_v10 = vpop.f32.mrb[126].mxu0  ;;  %2949 = vmatprep.mubr.msk.f32.mxu1 %vm899_vm1, %v1519_v48  ;;  %v2365_v16 = vld [vmem:[%s4047_s9 + $0x70] sm:$0xff]  }
 0x44b   :  { %v2628_v53 = vpop.f32.mrb[127].mxu0 }
 0x44c   :  { %v1359_v54 = vadd.f32 %v2626_v18, %v3666_v24  ;;  %v2629_v56 = vadd.f32 %v2628_v53, %v2627_v10  ;;  %2950 = vmatmul.mubr.msk.f32.gmra.mrb[60].mxu1 %vm899_vm1, %v1520_v12  ;;  %v2331_v53 = vunpack.c.l.bf16 %v2365_v16 }
 0x44e   :  { %v1425_v55 = vmax.f32 %v1359_v54, 0.0  ;;  %v1362_v57 = vadd.f32 %v2629_v56, %v3666_v24 }
 0x450   :  { %v1521_v61 = vmul.f32 %v2315_v51, %v1425_v55  ;;  %v1426_v7 = vmax.f32 %v1362_v57, 0.0  ;;  %v2630_v4 = vpop.f32.mrb[128].mxu0  ;;  %v2332_v55 = vunpack.c.h.bf16 %v2365_v16 }
 0x451   :  { %v2631_v1 = vpop.f32.mrb[129].mxu0 }
 0x452   :  { %v1522_v62 = vmul.f32 %v2316_v50, %v1426_v7  ;;  %v2632_v52 = vadd.f32 %v2631_v1, %v2630_v4  ;;  %v2633_v8 = vpop.f32.mrb[130].mxu0  ;;  %2952 = vmatprep.mubr.msk.f32.mxu1 %vm899_vm1, %v1521_v61  ;;  %v2366_v4 = vld [vmem:[%s4047_s9 + $0x78] sm:$0xff]  }
 0x453   :  { %v2634_v6 = vpop.f32.mrb[131].mxu0 }
 0x454   :  { %v1367_v13 = vadd.f32 %v2632_v52, %v3666_v24  ;;  %v2635_v2 = vadd.f32 %v2634_v6, %v2633_v8  ;;  %2953 = vmatmul.mubr.msk.f32.gmra.mrb[62].mxu1 %vm899_vm1, %v1522_v62  ;;  %v2335_v6 = vunpack.c.l.bf16 %v2366_v4 }
 0x456   :  { %v1427_v60 = vmax.f32 %v1367_v13, 0.0  ;;  %v1370_v14 = vadd.f32 %v2635_v2, %v3666_v24 }
 0x458   :  { %v1523_v3 = vmul.f32 %v2319_v58, %v1427_v60  ;;  %v1428_v5 = vmax.f32 %v1370_v14, 0.0  ;;  %v2636_v15 = vpop.f32.mrb[132].mxu0  ;;  %v2336_v60 = vunpack.c.h.bf16 %v2366_v4  ;;  %v3056_v4 = vld [vmem:[%s4041_s0] ss:$8 sps:$4 sm:$0xff]  }
 0x459   :  { %v2637_v11 = vpop.f32.mrb[133].mxu0 }
 0x45a   :  { %v1524_v63 = vmul.f32 %v2320_v59, %v1428_v5  ;;  %v2638_v20 = vadd.f32 %v2637_v11, %v2636_v15  ;;  %v2639_v21 = vpop.f32.mrb[134].mxu0  ;;  %2955 = vmatprep.mubr.msk.f32.mxu1 %vm899_vm1, %v1523_v3  ;;  %v3055_v5 = vld [vmem:[%s4041_s0 + $0x4] ss:$8 sps:$4 sm:$0xff]  }
 0x45b   :  { %v2640_v22 = vpop.f32.mrb[135].mxu0 }
 0x45c   :  { %v1375_v23 = vadd.f32 %v2638_v20, %v3666_v24  ;;  %v2641_v26 = vadd.f32 %v2640_v22, %v2639_v21  ;;  %2956 = vmatmul.mubr.msk.f32.gmra.mrb[64].mxu1 %vm899_vm1, %v1524_v63 }
 0x45e   :  { %v1429_v27 = vmax.f32 %v1375_v23, 0.0  ;;  %v1378_v28 = vadd.f32 %v2641_v26, %v3666_v24 }
 0x460   :  { %v1525_v30 = vmul.f32 %v2323_v25, %v1429_v27  ;;  %v1430_v31 = vmax.f32 %v1378_v28, 0.0  ;;  %v2642_v32 = vpop.f32.mrb[136].mxu0 }
 0x461   :  { %v2643_v34 = vpop.f32.mrb[137].mxu0 }
 0x462   :  { %v1526_v36 = vmul.f32 %v2324_v29, %v1430_v31  ;;  %v2644_v37 = vadd.f32 %v2643_v34, %v2642_v32  ;;  %v2645_v38 = vpop.f32.mrb[138].mxu0  ;;  %2958 = vmatprep.mubr.msk.f32.mxu1 %vm899_vm1, %v1525_v30 }
 0x463   :  { %v2646_v39 = vpop.f32.mrb[139].mxu0 }
 0x464   :  { %v1383_v40 = vadd.f32 %v2644_v37, %v3666_v24  ;;  %v2647_v42 = vadd.f32 %v2646_v39, %v2645_v38  ;;  %2959 = vmatmul.mubr.msk.f32.gmra.mrb[66].mxu1 %vm899_vm1, %v1526_v36 }
 0x466   :  { %v1431_v43 = vmax.f32 %v1383_v40, 0.0  ;;  %v1386_v44 = vadd.f32 %v2647_v42, %v3666_v24 }
 0x468   :  { %v1527_v46 = vmul.f32 %v2327_v41, %v1431_v43  ;;  %v1432_v47 = vmax.f32 %v1386_v44, 0.0  ;;  %v2648_v48 = vpop.f32.mrb[140].mxu0 }
 0x469   :  { %v2649_v49 = vpop.f32.mrb[141].mxu0 }
 0x46a   :  { %v1528_v17 = vmul.f32 %v2328_v45, %v1432_v47  ;;  %v2650_v33 = vadd.f32 %v2649_v49, %v2648_v48  ;;  %v2651_v12 = vpop.f32.mrb[142].mxu0  ;;  %2961 = vmatprep.mubr.msk.f32.mxu1 %vm899_vm1, %v1527_v46 }
 0x46b   :  { %v2652_v18 = vpop.f32.mrb[143].mxu0 }
 0x46c   :  { %v1391_v10 = vadd.f32 %v2650_v33, %v3666_v24  ;;  %v2653_v54 = vadd.f32 %v2652_v18, %v2651_v12  ;;  %2962 = vmatmul.mubr.msk.f32.gmra.mrb[68].mxu1 %vm899_vm1, %v1528_v17 }
 0x46e   :  { %v1433_v51 = vmax.f32 %v1391_v10, 0.0  ;;  %v1394_v56 = vadd.f32 %v2653_v54, %v3666_v24 }
 0x470   :  { %v1529_v57 = vmul.f32 %v2331_v53, %v1433_v51  ;;  %v1434_v50 = vmax.f32 %v1394_v56, 0.0  ;;  %v2654_v61 = vpop.f32.mrb[144].mxu0 }
 0x471   :  { %v2655_v7 = vpop.f32.mrb[145].mxu0 }
 0x472   :  { %v1530_v1 = vmul.f32 %v2332_v55, %v1434_v50  ;;  %v2656_v9 = vadd.f32 %v2655_v7, %v2654_v61  ;;  %v2657_v62 = vpop.f32.mrb[146].mxu0  ;;  %2964 = vmatprep.mubr.msk.f32.mxu1 %vm899_vm1, %v1529_v57 }
 0x473   :  { %v2658_v52 = vpop.f32.mrb[147].mxu0 }
 0x474   :  { %v1399_v8 = vadd.f32 %v2656_v9, %v3666_v24  ;;  %v2659_v13 = vadd.f32 %v2658_v52, %v2657_v62  ;;  %2965 = vmatmul.mubr.msk.f32.gmra.mrb[70].mxu1 %vm899_vm1, %v1530_v1  ;;  %v3057_v1 = vld [vmem:[%s4041_s0 + $0x14] ss:$8 sps:$4 sm:$0xff]   ;;  %v3058_v9 = vld [vmem:[%s4041_s0 + $0x10] ss:$8 sps:$4 sm:$0xff]   ;;  %v3059_v62 = vld [vmem:[%s4041_s0 + $0x24] ss:$8 sps:$4 sm:$0xff]  }
 0x475   :  { %v3060_v52 = vld [vmem:[%s4041_s0 + $0x20] ss:$8 sps:$4 sm:$0xff]  }
 0x476   :  { %v1435_v58 = vmax.f32 %v1399_v8, 0.0  ;;  %v1402_v2 = vadd.f32 %v2659_v13, %v3666_v24  ;;  %v3061_v8 = vld [vmem:[%s4041_s0 + $0x34] ss:$8 sps:$4 sm:$0xff]   ;;  %v3063_v13 = vld [vmem:[%s4041_s0 + $0x44] ss:$8 sps:$4 sm:$0xff]  }
 0x478   :  { %v1531_v14 = vmul.f32 %v2335_v6, %v1435_v58  ;;  %v1436_v59 = vmax.f32 %v1402_v2, 0.0  ;;  %v3062_v6 = vld [vmem:[%s4041_s0 + $0x30] ss:$8 sps:$4 sm:$0xff]   ;;  %v3064_v58 = vld [vmem:[%s4041_s0 + $0x40] ss:$8 sps:$4 sm:$0xff]  }
 0x479   :  { %v3065_v2 = vld [vmem:[%s4041_s0 + $0x50] ss:$8 sps:$4 sm:$0xff]  }
 0x47a   :  { %v1532_v3 = vmul.f32 %v2336_v60, %v1436_v59  ;;  %2967 = vmatprep.mubr.msk.f32.mxu1 %vm899_vm1, %v1531_v14  ;;  %v3066_v60 = vld [vmem:[%s4041_s0 + $0x64] ss:$8 sps:$4 sm:$0xff]   ;;  %v3067_v14 = vld [vmem:[%s4041_s0 + $0x60] ss:$8 sps:$4 sm:$0xff]   ;;  %v3068_v59 = vld [vmem:[%s4041_s0 + $0x74] ss:$8 sps:$4 sm:$0xff]  }
 0x47c   :  { %2968 = vmatmul.mubr.msk.f32.gmra.mrb[72].mxu1 %vm899_vm1, %v1532_v3  ;;  %v3070_v3 = vld [vmem:[%s4041_s0 + $0x84] ss:$8 sps:$4 sm:$0xff]  }
 0x47d   :  { %1913 = vmatprep.mubr.bf16.mxu1 %v3055_v5  ;;  %v3071_v5 = vld [vmem:[%s4041_s0 + $0x80] ss:$8 sps:$4 sm:$0xff]  }
 0x4d7   :  { %v2924_v15 = vpop.f32.mrb[148].mxu0 }
 0x4d8   :  { %v1699_v11 = vpop.f32.mrb[149].mxu0 }
 0x4d9   :  { %v1858_v0 = vpack.c.bf16 %v2924_v15, %v1699_v11  ;;  %v3072_v15 = vld [vmem:[%s4041_s0 + $0x94] ss:$8 sps:$4 sm:$0xff]   ;;  %v3073_v11 = vld [vmem:[%s4041_s0 + $0x90] ss:$8 sps:$4 sm:$0xff]  }
 0x4df   :  { %v2927_v63 = vpop.f32.mrb[44].mxu1 }
 0x4e0   :  { %v1709_v20 = vpop.f32.mrb[45].mxu1 }
 0x4e1   :  { %v1859_v21 = vpack.c.bf16 %v2927_v63, %v1709_v20  ;;  %v3075_v63 = vld [vmem:[%s4041_s0 + $0xa0] ss:$8 sps:$4 sm:$0xff]   ;;  %v3076_v20 = vld [vmem:[%s4041_s0 + $0xb4] ss:$8 sps:$4 sm:$0xff]  }
 0x4e7   :  { %v2930_v24 = vpop.f32.mrb[46].mxu1 }
 0x4e8   :  { %v1719_v22 = vpop.f32.mrb[47].mxu1 }
 0x4e9   :  { %v1860_v23 = vpack.c.bf16 %v2930_v24, %v1719_v22  ;;  %v3078_v24 = vld [vmem:[%s4041_s0 + $0xc4] ss:$8 sps:$4 sm:$0xff]   ;;  %v3079_v22 = vld [vmem:[%s4041_s0 + $0xc0] ss:$8 sps:$4 sm:$0xff]  }
 0x4ef   :  { %v2933_v25 = vpop.f32.mrb[48].mxu1 }
 0x4f0   :  { %v1729_v26 = vpop.f32.mrb[49].mxu1 }
 0x4f1   :  { %v1861_v27 = vpack.c.bf16 %v2933_v25, %v1729_v26  ;;  %v3081_v25 = vld [vmem:[%s4041_s0 + $0xd0] ss:$8 sps:$4 sm:$0xff]   ;;  %v3082_v26 = vld [vmem:[%s4041_s0 + $0xe4] ss:$8 sps:$4 sm:$0xff]  }
 0x4f7   :  { %v2936_v28 = vpop.f32.mrb[50].mxu1 }
 0x4f8   :  { %v1739_v29 = vpop.f32.mrb[51].mxu1 }
 0x4f9   :  { %v1862_v30 = vpack.c.bf16 %v2936_v28, %v1739_v29  ;;  %v3084_v28 = vld [vmem:[%s4041_s0 + $0xf4] ss:$8 sps:$4 sm:$0xff]   ;;  %v3085_v29 = vld [vmem:[%s4041_s0 + $0xf0] ss:$8 sps:$4 sm:$0xff]  }
 0x4ff   :  { %v2939_v31 = vpop.f32.mrb[52].mxu1 }
 0x500   :  { %v1749_v32 = vpop.f32.mrb[53].mxu1 }
 0x501   :  { %v1863_v34 = vpack.c.bf16 %v2939_v31, %v1749_v32  ;;  %v3877_v31 = vld [vmem:[%s4048_s7] ss:$0 sm:$0xff] }
 0x507   :  { %v2942_v35 = vpop.f32.mrb[54].mxu1 }
 0x508   :  { %v1759_v36 = vpop.f32.mrb[55].mxu1 }
 0x509   :  { %v1864_v37 = vpack.c.bf16 %v2942_v35, %v1759_v36 }
 0x50f   :  { %v2945_v38 = vpop.f32.mrb[56].mxu1 }
 0x510   :  { %v1769_v39 = vpop.f32.mrb[57].mxu1 }
 0x511   :  { %v1865_v40 = vpack.c.bf16 %v2945_v38, %v1769_v39 }
 0x517   :  { %v2948_v41 = vpop.f32.mrb[58].mxu1 }
 0x518   :  { %v1779_v42 = vpop.f32.mrb[59].mxu1 }
 0x519   :  { %v1866_v43 = vpack.c.bf16 %v2948_v41, %v1779_v42 }
 0x51b   :  { %2696 = vmatprep.subr.bf16.mxu1 %v1866_v43 }
 0x51c   :  { %2697 = vmatpush3.bf16.msra.mxu1 %v1858_v0  ;;  %v3074_v0 = vld [vmem:[%s4041_s0 + $0xa4] ss:$8 sps:$4 sm:$0xff]  }
 0x51f   :  { %v2951_v44 = vpop.f32.mrb[60].mxu1 }
 0x520   :  { %v1789_v45 = vpop.f32.mrb[61].mxu1 }
 0x521   :  { %v1867_v46 = vpack.c.bf16 %v2951_v44, %v1789_v45 }
 0x523   :  { %2698 = vmatprep.subr.bf16.mxu1 %v1867_v46 }
 0x524   :  { %2699 = vmatpush3.bf16.msra.mxu1 %v1859_v21  ;;  %v3077_v21 = vld [vmem:[%s4041_s0 + $0xb0] ss:$8 sps:$4 sm:$0xff]  }
 0x527   :  { %v2954_v47 = vpop.f32.mrb[62].mxu1 }
 0x528   :  { %v1799_v48 = vpop.f32.mrb[63].mxu1 }
 0x529   :  { %v1868_v49 = vpack.c.bf16 %v2954_v47, %v1799_v48 }
 0x52b   :  { %2700 = vmatprep.subr.bf16.mxu1 %v1868_v49 }
 0x52c   :  { %2701 = vmatpush3.bf16.msra.mxu1 %v1860_v23  ;;  %v3080_v23 = vld [vmem:[%s4041_s0 + $0xd4] ss:$8 sps:$4 sm:$0xff]  }
 0x52f   :  { %v2957_v16 = vpop.f32.mrb[64].mxu1 }
 0x530   :  { %v1809_v17 = vpop.f32.mrb[65].mxu1 }
 0x531   :  { %v1869_v33 = vpack.c.bf16 %v2957_v16, %v1809_v17 }
 0x533   :  { %2702 = vmatprep.subr.bf16.mxu1 %v1869_v33 }
 0x534   :  { %2703 = vmatpush3.bf16.msra.mxu1 %v1861_v27  ;;  %v3083_v27 = vld [vmem:[%s4041_s0 + $0xe0] ss:$8 sps:$4 sm:$0xff]  }
 0x537   :  { %v2960_v12 = vpop.f32.mrb[66].mxu1 }
 0x538   :  { %v1819_v18 = vpop.f32.mrb[67].mxu1 }
 0x539   :  { %v1870_v10 = vpack.c.bf16 %v2960_v12, %v1819_v18 }
 0x53b   :  { %2704 = vmatprep.subr.bf16.mxu1 %v1870_v10 }
 0x53c   :  { %2705 = vmatpush3.bf16.msra.mxu1 %v1862_v30 }
 0x53f   :  { %v2963_v53 = vpop.f32.mrb[68].mxu1 }
 0x540   :  { %v1829_v54 = vpop.f32.mrb[69].mxu1 }
 0x541   :  { %v1871_v51 = vpack.c.bf16 %v2963_v53, %v1829_v54 }
 0x543   :  { %2706 = vmatprep.subr.bf16.mxu1 %v1871_v51 }
 0x544   :  { %2707 = vmatpush3.bf16.msra.mxu1 %v1863_v34 }
 0x547   :  { %v2966_v56 = vpop.f32.mrb[70].mxu1 }
 0x548   :  { %v1839_v55 = vpop.f32.mrb[71].mxu1 }
 0x549   :  { %v1872_v57 = vpack.c.bf16 %v2966_v56, %v1839_v55 }
 0x54b   :  { %2708 = vmatprep.subr.bf16.mxu1 %v1872_v57 }
 0x54c   :  { %2709 = vmatpush3.bf16.msra.mxu1 %v1864_v37 }
 0x54f   :  { %v2969_v50 = vpop.f32.mrb[72].mxu1 }
 0x550   :  { %v1849_v61 = vpop.f32.mrb[73].mxu1 }
 0x551   :  { %v1873_v7 = vpack.c.bf16 %v2969_v50, %v1849_v61 }
 0x553   :  { %2710 = vmatprep.subr.bf16.mxu1 %v1873_v7 }
 0x554   :  { %2711 = vmatpush3.bf16.msra.mxu1 %v1865_v40 }
 0x557   :  { %1914 = vmatmul.mubr.bf16.vlgmr.msra.gmra.mrb[76].mxu1 %v3056_v4 }
 0x558   :  { %1921 = vmatprep.mubr.bf16.mxu1 %v3057_v1 }
 0x55f   :  { %1922 = vmatmul.mubr.bf16.gmra.mrb[80].mxu1 %v3058_v9 }
 0x560   :  { %1929 = vmatprep.mubr.bf16.mxu1 %v3059_v62 }
 0x567   :  { %1930 = vmatmul.mubr.bf16.gmra.mrb[84].mxu1 %v3060_v52 }
 0x568   :  { %1937 = vmatprep.mubr.bf16.mxu1 %v3061_v8 }
 0x56f   :  { %1938 = vmatmul.mubr.bf16.gmra.mrb[88].mxu1 %v3062_v6 }
 0x570   :  { %1945 = vmatprep.mubr.bf16.mxu1 %v3063_v13 }
 0x577   :  { %1946 = vmatmul.mubr.bf16.gmra.mrb[92].mxu1 %v3064_v58 }
 0x578   :  { %1953 = vmatprep.mubr.bf16.mxu1 %v3633_v19  ;;  %v3069_v19 = vld [vmem:[%s4041_s0 + $0x70] ss:$8 sps:$4 sm:$0xff]  }
 0x57f   :  { %1954 = vmatmul.mubr.bf16.gmra.mrb[96].mxu1 %v3065_v2 }
 0x580   :  { %1961 = vmatprep.mubr.bf16.mxu1 %v3066_v60 }
 0x587   :  { %1962 = vmatmul.mubr.bf16.gmra.mrb[100].mxu1 %v3067_v14 }
 0x588   :  { %1969 = vmatprep.mubr.bf16.mxu1 %v3068_v59 }
 0x58f   :  { %1970 = vmatmul.mubr.bf16.gmra.mrb[104].mxu1 %v3069_v19 }
 0x590   :  { %1977 = vmatprep.mubr.bf16.mxu1 %v3070_v3 }
 0x597   :  { %1978 = vmatmul.mubr.bf16.gmra.mrb[108].mxu1 %v3071_v5 }
 0x598   :  { %1985 = vmatprep.mubr.bf16.mxu1 %v3072_v15 }
 0x59f   :  { %1986 = vmatmul.mubr.bf16.gmra.mrb[112].mxu1 %v3073_v11 }
 0x5a0   :  { %1993 = vmatprep.mubr.bf16.mxu1 %v3074_v0 }
 0x5a7   :  { %1994 = vmatmul.mubr.bf16.gmra.mrb[116].mxu1 %v3075_v63 }
 0x5a8   :  { %2001 = vmatprep.mubr.bf16.mxu1 %v3076_v20 }
 0x5af   :  { %2002 = vmatmul.mubr.bf16.gmra.mrb[120].mxu1 %v3077_v21 }
 0x5b0   :  { %2009 = vmatprep.mubr.bf16.mxu1 %v3078_v24 }
 0x5b7   :  { %2010 = vmatmul.mubr.bf16.gmra.mrb[124].mxu1 %v3079_v22 }
 0x5b8   :  { %2017 = vmatprep.mubr.bf16.mxu1 %v3080_v23 }
 0x5bf   :  { %2018 = vmatmul.mubr.bf16.gmra.mrb[128].mxu1 %v3081_v25 }
 0x5c0   :  { %2025 = vmatprep.mubr.bf16.mxu1 %v3082_v26 }
 0x5c7   :  { %2026 = vmatmul.mubr.bf16.gmra.mrb[132].mxu1 %v3083_v27 }
 0x5c8   :  { %2033 = vmatprep.mubr.bf16.mxu1 %v3084_v28 }
 0x5cf   :  { %2034 = vmatmul.mubr.bf16.gmra.mrb[136].mxu1 %v3085_v29 }
 0x62a   :  { %v2712_v30 = vpop.f32.mrb[76].mxu1 }
 0x62b   :  { %v2713_v32 = vpop.f32.mrb[77].mxu1 }
 0x62c   :  { %v2714_v34 = vadd.f32 %v2713_v32, %v2712_v30  ;;  %v2715_v35 = vpop.f32.mrb[78].mxu1 }
 0x62d   :  { %v2716_v36 = vpop.f32.mrb[79].mxu1 }
 0x62e   :  { %v1916_v37 = vadd.f32 %v2714_v34, %v3877_v31  ;;  %v2717_v38 = vadd.f32 %v2716_v36, %v2715_v35 }
 0x630   :  { %2042 = vst.msk [vmem:[%s4049_s10] sm:$0xff] %vm69_vm0, %v1916_v37  ;;  %v1919_v39 = vadd.f32 %v2717_v38, %v3877_v31 }
 0x632   :  { %2043 = vst.msk [vmem:[%s4049_s10 + $0x8] sm:$0xff] %vm69_vm0, %v1919_v39  ;;  %v2718_v40 = vpop.f32.mrb[80].mxu1 }
 0x633   :  { %v2719_v41 = vpop.f32.mrb[81].mxu1 }
 0x634   :  { %v2720_v42 = vadd.f32 %v2719_v41, %v2718_v40  ;;  %v2721_v43 = vpop.f32.mrb[82].mxu1 }
 0x635   :  { %v2722_v44 = vpop.f32.mrb[83].mxu1 }
 0x636   :  { %v1924_v45 = vadd.f32 %v2720_v42, %v3877_v31  ;;  %v2723_v46 = vadd.f32 %v2722_v44, %v2721_v43 }
 0x638   :  { %2044 = vst.msk [vmem:[%s4049_s10 + $0x10] sm:$0xff] %vm69_vm0, %v1924_v45  ;;  %v1927_v47 = vadd.f32 %v2723_v46, %v3877_v31 }
 0x63a   :  { %2045 = vst.msk [vmem:[%s4049_s10 + $0x18] sm:$0xff] %vm69_vm0, %v1927_v47  ;;  %v2724_v48 = vpop.f32.mrb[84].mxu1 }
 0x63b   :  { %v2725_v49 = vpop.f32.mrb[85].mxu1 }
 0x63c   :  { %v2726_v16 = vadd.f32 %v2725_v49, %v2724_v48  ;;  %v2727_v17 = vpop.f32.mrb[86].mxu1 }
 0x63d   :  { %v2728_v33 = vpop.f32.mrb[87].mxu1 }
 0x63e   :  { %v1932_v12 = vadd.f32 %v2726_v16, %v3877_v31  ;;  %v2729_v18 = vadd.f32 %v2728_v33, %v2727_v17 }
 0x640   :  { %2046 = vst.msk [vmem:[%s4049_s10 + $0x20] sm:$0xff] %vm69_vm0, %v1932_v12  ;;  %v1935_v10 = vadd.f32 %v2729_v18, %v3877_v31 }
 0x642   :  { %2047 = vst.msk [vmem:[%s4049_s10 + $0x28] sm:$0xff] %vm69_vm0, %v1935_v10  ;;  %v2730_v53 = vpop.f32.mrb[88].mxu1 }
 0x643   :  { %v2731_v54 = vpop.f32.mrb[89].mxu1 }
 0x644   :  { %v2732_v51 = vadd.f32 %v2731_v54, %v2730_v53  ;;  %v2733_v56 = vpop.f32.mrb[90].mxu1 }
 0x645   :  { %v2734_v55 = vpop.f32.mrb[91].mxu1 }
 0x646   :  { %v1940_v57 = vadd.f32 %v2732_v51, %v3877_v31  ;;  %v2735_v50 = vadd.f32 %v2734_v55, %v2733_v56 }
 0x648   :  { %2048 = vst.msk [vmem:[%s4049_s10 + $0x30] sm:$0xff] %vm69_vm0, %v1940_v57  ;;  %v1943_v61 = vadd.f32 %v2735_v50, %v3877_v31 }
 0x64a   :  { %2049 = vst.msk [vmem:[%s4049_s10 + $0x38] sm:$0xff] %vm69_vm0, %v1943_v61  ;;  %v2736_v7 = vpop.f32.mrb[92].mxu1 }
 0x64b   :  { %v2737_v4 = vpop.f32.mrb[93].mxu1 }
 0x64c   :  { %v2738_v1 = vadd.f32 %v2737_v4, %v2736_v7  ;;  %v2739_v9 = vpop.f32.mrb[94].mxu1 }
 0x64d   :  { %v2740_v62 = vpop.f32.mrb[95].mxu1 }
 0x64e   :  { %v1948_v52 = vadd.f32 %v2738_v1, %v3877_v31  ;;  %v2741_v8 = vadd.f32 %v2740_v62, %v2739_v9 }
 0x650   :  { %2050 = vst.msk [vmem:[%s4049_s10 + $0x40] sm:$0xff] %vm69_vm0, %v1948_v52  ;;  %v1951_v6 = vadd.f32 %v2741_v8, %v3877_v31 }
 0x652   :  { %2051 = vst.msk [vmem:[%s4049_s10 + $0x48] sm:$0xff] %vm69_vm0, %v1951_v6  ;;  %v2742_v13 = vpop.f32.mrb[96].mxu1 }
 0x653   :  { %v2743_v58 = vpop.f32.mrb[97].mxu1 }
 0x654   :  { %v2744_v2 = vadd.f32 %v2743_v58, %v2742_v13  ;;  %v2745_v60 = vpop.f32.mrb[98].mxu1 }
 0x655   :  { %v2746_v14 = vpop.f32.mrb[99].mxu1 }
 0x656   :  { %v1956_v59 = vadd.f32 %v2744_v2, %v3877_v31  ;;  %v2747_v19 = vadd.f32 %v2746_v14, %v2745_v60 }
 0x658   :  { %2052 = vst.msk [vmem:[%s4049_s10 + $0x50] sm:$0xff] %vm69_vm0, %v1956_v59  ;;  %v1959_v3 = vadd.f32 %v2747_v19, %v3877_v31 }
 0x65a   :  { %2053 = vst.msk [vmem:[%s4049_s10 + $0x58] sm:$0xff] %vm69_vm0, %v1959_v3  ;;  %v2748_v5 = vpop.f32.mrb[100].mxu1 }
 0x65b   :  { %v2749_v15 = vpop.f32.mrb[101].mxu1 }
 0x65c   :  { %v2750_v11 = vadd.f32 %v2749_v15, %v2748_v5  ;;  %v2751_v0 = vpop.f32.mrb[102].mxu1 }
 0x65d   :  { %v2752_v63 = vpop.f32.mrb[103].mxu1 }
 0x65e   :  { %v1964_v20 = vadd.f32 %v2750_v11, %v3877_v31  ;;  %v2753_v21 = vadd.f32 %v2752_v63, %v2751_v0 }
 0x660   :  { %2054 = vst.msk [vmem:[%s4049_s10 + $0x60] sm:$0xff] %vm69_vm0, %v1964_v20  ;;  %v1967_v24 = vadd.f32 %v2753_v21, %v3877_v31 }
 0x662   :  { %2055 = vst.msk [vmem:[%s4049_s10 + $0x68] sm:$0xff] %vm69_vm0, %v1967_v24  ;;  %v2754_v22 = vpop.f32.mrb[104].mxu1 }
 0x663   :  { %v2755_v23 = vpop.f32.mrb[105].mxu1 }
 0x664   :  { %v2756_v25 = vadd.f32 %v2755_v23, %v2754_v22  ;;  %v2757_v26 = vpop.f32.mrb[106].mxu1 }
 0x665   :  { %v2758_v27 = vpop.f32.mrb[107].mxu1 }
 0x666   :  { %v1972_v28 = vadd.f32 %v2756_v25, %v3877_v31  ;;  %v2759_v29 = vadd.f32 %v2758_v27, %v2757_v26 }
 0x668   :  { %2056 = vst.msk [vmem:[%s4049_s10 + $0x70] sm:$0xff] %vm69_vm0, %v1972_v28  ;;  %v1975_v30 = vadd.f32 %v2759_v29, %v3877_v31 }
 0x66a   :  { %2057 = vst.msk [vmem:[%s4049_s10 + $0x78] sm:$0xff] %vm69_vm0, %v1975_v30  ;;  %v2760_v32 = vpop.f32.mrb[108].mxu1 }
 0x66b   :  { %v2761_v34 = vpop.f32.mrb[109].mxu1 }
 0x66c   :  { %v2762_v35 = vadd.f32 %v2761_v34, %v2760_v32  ;;  %v2763_v36 = vpop.f32.mrb[110].mxu1 }
 0x66d   :  { %v2764_v37 = vpop.f32.mrb[111].mxu1 }
 0x66e   :  { %v1980_v38 = vadd.f32 %v2762_v35, %v3877_v31  ;;  %v2765_v39 = vadd.f32 %v2764_v37, %v2763_v36 }
 0x670   :  { %2058 = vst.msk [vmem:[%s4049_s10 + $0x80] sm:$0xff] %vm69_vm0, %v1980_v38  ;;  %v1983_v40 = vadd.f32 %v2765_v39, %v3877_v31 }
 0x672   :  { %2059 = vst.msk [vmem:[%s4049_s10 + $0x88] sm:$0xff] %vm69_vm0, %v1983_v40  ;;  %v2766_v41 = vpop.f32.mrb[112].mxu1 }
 0x673   :  { %v2767_v42 = vpop.f32.mrb[113].mxu1 }
 0x674   :  { %v2768_v43 = vadd.f32 %v2767_v42, %v2766_v41  ;;  %v2769_v44 = vpop.f32.mrb[114].mxu1 }
 0x675   :  { %v2770_v45 = vpop.f32.mrb[115].mxu1 }
 0x676   :  { %v1988_v46 = vadd.f32 %v2768_v43, %v3877_v31  ;;  %v2771_v47 = vadd.f32 %v2770_v45, %v2769_v44 }
 0x678   :  { %2060 = vst.msk [vmem:[%s4049_s10 + $0x90] sm:$0xff] %vm69_vm0, %v1988_v46  ;;  %v1991_v48 = vadd.f32 %v2771_v47, %v3877_v31 }
 0x67a   :  { %2061 = vst.msk [vmem:[%s4049_s10 + $0x98] sm:$0xff] %vm69_vm0, %v1991_v48  ;;  %v2772_v49 = vpop.f32.mrb[116].mxu1 }
 0x67b   :  { %v2773_v16 = vpop.f32.mrb[117].mxu1 }
 0x67c   :  { %v2774_v17 = vadd.f32 %v2773_v16, %v2772_v49  ;;  %v2775_v33 = vpop.f32.mrb[118].mxu1 }
 0x67d   :  { %v2776_v12 = vpop.f32.mrb[119].mxu1 }
 0x67e   :  { %v1996_v18 = vadd.f32 %v2774_v17, %v3877_v31  ;;  %v2777_v10 = vadd.f32 %v2776_v12, %v2775_v33 }
 0x680   :  { %2062 = vst.msk [vmem:[%s4049_s10 + $0xa0] sm:$0xff] %vm69_vm0, %v1996_v18  ;;  %v1999_v53 = vadd.f32 %v2777_v10, %v3877_v31 }
 0x682   :  { %2063 = vst.msk [vmem:[%s4049_s10 + $0xa8] sm:$0xff] %vm69_vm0, %v1999_v53  ;;  %v2778_v54 = vpop.f32.mrb[120].mxu1 }
 0x683   :  { %v2779_v51 = vpop.f32.mrb[121].mxu1 }
 0x684   :  { %v2780_v56 = vadd.f32 %v2779_v51, %v2778_v54  ;;  %v2781_v55 = vpop.f32.mrb[122].mxu1 }
 0x685   :  { %v2782_v57 = vpop.f32.mrb[123].mxu1 }
 0x686   :  { %v2004_v50 = vadd.f32 %v2780_v56, %v3877_v31  ;;  %v2783_v61 = vadd.f32 %v2782_v57, %v2781_v55 }
 0x688   :  { %2064 = vst.msk [vmem:[%s4049_s10 + $0xb0] sm:$0xff] %vm69_vm0, %v2004_v50  ;;  %v2007_v7 = vadd.f32 %v2783_v61, %v3877_v31 }
 0x68a   :  { %2065 = vst.msk [vmem:[%s4049_s10 + $0xb8] sm:$0xff] %vm69_vm0, %v2007_v7  ;;  %v2784_v4 = vpop.f32.mrb[124].mxu1 }
 0x68b   :  { %v2785_v1 = vpop.f32.mrb[125].mxu1 }
 0x68c   :  { %v2786_v9 = vadd.f32 %v2785_v1, %v2784_v4  ;;  %v2787_v62 = vpop.f32.mrb[126].mxu1 }
 0x68d   :  { %v2788_v52 = vpop.f32.mrb[127].mxu1 }
 0x68e   :  { %v2012_v8 = vadd.f32 %v2786_v9, %v3877_v31  ;;  %v2789_v6 = vadd.f32 %v2788_v52, %v2787_v62 }
 0x690   :  { %2066 = vst.msk [vmem:[%s4049_s10 + $0xc0] sm:$0xff] %vm69_vm0, %v2012_v8  ;;  %v2015_v13 = vadd.f32 %v2789_v6, %v3877_v31 }
 0x692   :  { %2067 = vst.msk [vmem:[%s4049_s10 + $0xc8] sm:$0xff] %vm69_vm0, %v2015_v13  ;;  %v2790_v58 = vpop.f32.mrb[128].mxu1 }
 0x693   :  { %v2791_v2 = vpop.f32.mrb[129].mxu1 }
 0x694   :  { %v2792_v60 = vadd.f32 %v2791_v2, %v2790_v58  ;;  %v2793_v14 = vpop.f32.mrb[130].mxu1 }
 0x695   :  { %v2794_v59 = vpop.f32.mrb[131].mxu1 }
 0x696   :  { %v2020_v19 = vadd.f32 %v2792_v60, %v3877_v31  ;;  %v2795_v3 = vadd.f32 %v2794_v59, %v2793_v14 }
 0x698   :  { %2068 = vst.msk [vmem:[%s4049_s10 + $0xd0] sm:$0xff] %vm69_vm0, %v2020_v19  ;;  %v2023_v5 = vadd.f32 %v2795_v3, %v3877_v31 }
 0x69a   :  { %2069 = vst.msk [vmem:[%s4049_s10 + $0xd8] sm:$0xff] %vm69_vm0, %v2023_v5  ;;  %v2796_v15 = vpop.f32.mrb[132].mxu1 }
 0x69b   :  { %v2797_v11 = vpop.f32.mrb[133].mxu1 }
 0x69c   :  { %v2798_v0 = vadd.f32 %v2797_v11, %v2796_v15  ;;  %v2799_v63 = vpop.f32.mrb[134].mxu1 }
 0x69d   :  { %v2800_v20 = vpop.f32.mrb[135].mxu1 }
 0x69e   :  { %v2028_v21 = vadd.f32 %v2798_v0, %v3877_v31  ;;  %v2801_v24 = vadd.f32 %v2800_v20, %v2799_v63 }
 0x6a0   :  { %2070 = vst.msk [vmem:[%s4049_s10 + $0xe0] sm:$0xff] %vm69_vm0, %v2028_v21  ;;  %v2031_v22 = vadd.f32 %v2801_v24, %v3877_v31 }
 0x6a2   :  { %2071 = vst.msk [vmem:[%s4049_s10 + $0xe8] sm:$0xff] %vm69_vm0, %v2031_v22  ;;  %v2802_v23 = vpop.f32.mrb[136].mxu1 }
 0x6a3   :  { %v2803_v25 = vpop.f32.mrb[137].mxu1 }
 0x6a4   :  { %v2804_v26 = vadd.f32 %v2803_v25, %v2802_v23  ;;  %v2805_v27 = vpop.f32.mrb[138].mxu1 }
 0x6a5   :  { %v2806_v28 = vpop.f32.mrb[139].mxu1 }
 0x6a6   :  { %v2036_v29 = vadd.f32 %v2804_v26, %v3877_v31  ;;  %v2807_v30 = vadd.f32 %v2806_v28, %v2805_v27 }
 0x6a8   :  { %2072 = vst.msk [vmem:[%s4049_s10 + $0xf0] sm:$0xff] %vm69_vm0, %v2036_v29  ;;  %v2039_v32 = vadd.f32 %v2807_v30, %v3877_v31 }
 0x6aa   :  { %2073 = vst.msk [vmem:[%s4049_s10 + $0xf8] sm:$0xff] %vm69_vm0, %v2039_v32 }

</bundles_post_ra>
